<compile_context>
chip_gen: v5e
topology: v5e:2x2
jax: 0.10.0
libtpu: 0.0.40
codegen_flags: <defaults>
</compile_context>

<pallas_src>
import math
from functools import partial

import jax
import jax.numpy as jnp
from jax.experimental import pallas as pl
from jax.experimental.pallas import tpu as pltpu


def mlp_kernel(x_ref, w1_ref, b1_ref, w2_ref, b2_ref, w3_ref, b3_ref,
               w4_ref, b4_ref, o_ref, *, approx_recip):
    cdt = w1_ref.dtype                      # compute dtype for MXU inputs
    x = x_ref[...].astype(cdt)              # in-kernel cast (VPU slack)

    # fc1..fc3 on the MXU: cdt inputs, f32 accumulation, f32 bias + ReLU (VPU).
    h = jnp.dot(x, w1_ref[...], preferred_element_type=jnp.float32) + b1_ref[...]
    h = jnp.maximum(h, 0.0)
    h = jnp.dot(h.astype(cdt), w2_ref[...],
                preferred_element_type=jnp.float32) + b2_ref[...]
    h = jnp.maximum(h, 0.0)
    h = jnp.dot(h.astype(cdt), w3_ref[...],
                preferred_element_type=jnp.float32) + b3_ref[...]
    h = jnp.maximum(h, 0.0)                 # (tile_b, 128) f32

    # fc4 (128 -> 1) off the MXU, in f32: broadcast-multiply by w4 (1, 128)
    # and lane-reduce.  No (tile_b, 128) transpose through the XLU.
    y = jnp.sum(h * w4_ref[...], axis=-1, keepdims=True) + b4_ref[...]  # (tile_b, 1)
    h4 = jnp.maximum(y, 0.0)

    # Relayout only the tiny column to the lane-dense output slab: (1, tile_b).
    h4t = h4.T

    # fc5 = Sigmoid.  h4 >= 0 so exp(-h4) <= 1 (no overflow); the trailing
    # F.relu is a no-op on sigmoid output and is dropped (exactness preserving).
    o_ref[...] = pl.reciprocal(1.0 + jnp.exp(-h4t), approx=approx_recip)


def _round_up(x, m):
    return ((x + m - 1) // m) * m


def _pick_tile_b(batch, tile_b=None):
    """Device-aware batch tile.  v5e: <=1024 (16 MiB scoped VMEM default);
    v6e/v7x: <=2048 (32 MiB).  On v7x keep >=2 grid steps when possible so the
    'parallel' batch axis is split across the two TensorCores."""
    try:
        kind = jax.devices()[0].device_kind.lower()
    except Exception:  # pragma: no cover - defensive
        kind = ""
    is_v5e = ("v5 lite" in kind) or ("v5e" in kind) or ("v5litepod" in kind)
    is_v7 = "v7" in kind
    granule = 128 if is_v5e else 256
    target = 1024 if is_v5e else 2048
    if tile_b is None:
        tile_b = target
        if is_v7:
            half = _round_up(pl.cdiv(batch, 2), granule)
            tile_b = min(tile_b, max(half, granule))
    # never use a tile larger than the padded batch
    tile_b = min(tile_b, _round_up(batch, granule))
    return max(tile_b, 8)


def baseline_nobatch_forward(x, params, *, tile_b=None,
                             compute_dtype=jnp.bfloat16):
    """Run the 4-layer MLP.  x: (B, input_dim) f32.  Returns (B, 1) f32.

    tile_b: batch rows per grid step (None = device-aware default).
    compute_dtype: dtype fed to the MXU for fc1..fc3 (bf16 recommended on
    v6e/v7x); accumulation / elementwise / fc4 stay f32.
    """
    (w1, b1), (w2, b2), (w3, b3), (w4, b4) = params
    B, in_dim = x.shape
    tile_b = _pick_tile_b(B, tile_b)
    nt = pl.cdiv(B, tile_b)
    b_pad = nt * tile_b

    xp = x
    if b_pad != B:
        xp = jnp.pad(xp, ((0, b_pad - B), (0, 0)))   # zero rows: finite epilogue

    # MXU weights in compute dtype (halves weight DMA when bf16); fc4 weight
    # never touches the MXU so it stays f32, stored as a (1, 128) row.
    w1c = w1.astype(compute_dtype)
    w2c = w2.astype(compute_dtype)
    w3c = w3.astype(compute_dtype)
    w4v = jnp.reshape(w4, (1, w4.shape[0])).astype(jnp.float32)   # (1, 128)

    const = lambda i: (0, 0)  # weights/biases: resident, never re-fetched
    approx = compute_dtype != jnp.float32

    weight_args = (w1c, b1, w2c, b2, w3c, b3, w4v, b4)
    flops = 2 * b_pad * sum(int(w.shape[0] * w.shape[1]) for w in (w1, w2, w3, w4))
    bytes_accessed = int(
        xp.size * xp.dtype.itemsize
        + sum(int(a.size) * a.dtype.itemsize for a in weight_args)
        + b_pad * 4)

    out = pl.pallas_call(
        partial(mlp_kernel, approx_recip=approx),
        out_shape=jax.ShapeDtypeStruct((1, b_pad), jnp.float32),
        grid=(nt,),
        in_specs=[
            pl.BlockSpec((tile_b, in_dim), lambda i: (i, 0)),   # x: batch-tiled
            pl.BlockSpec(w1c.shape, const), pl.BlockSpec(b1.shape, const),
            pl.BlockSpec(w2c.shape, const), pl.BlockSpec(b2.shape, const),
            pl.BlockSpec(w3c.shape, const), pl.BlockSpec(b3.shape, const),
            pl.BlockSpec(w4v.shape, const), pl.BlockSpec(b4.shape, const),
        ],
        # Lane-dense output slab: each grid step writes an unmasked (1, tile_b)
        # tile instead of tile_b single-lane masked stores.
        out_specs=pl.BlockSpec((1, tile_b), lambda i: (0, i)),
        compiler_params=pltpu.CompilerParams(
            dimension_semantics=("parallel",)),
        cost_estimate=pl.CostEstimate(flops=flops, transcendentals=b_pad,
                                      bytes_accessed=bytes_accessed),
    )(xp, *weight_args)

    # Back to the PyTorch layout (B, 1).
    return out.reshape(-1)[:B, None]


def xavier_normal(key, fan_in, fan_out):
    # torch.nn.init.xavier_normal_ with gain=1.0; PyTorch weight is (out, in),
    # stored here pre-transposed as (in, out) so the kernel does x @ W + b.
    std = math.sqrt(2.0 / (fan_in + fan_out))
    return std * jax.random.normal(key, (fan_in, fan_out), dtype=jnp.float32)


def init_params(key, input_dim):
    dims = [(input_dim, 512), (512, 256), (256, 128), (128, 1)]
    keys = jax.random.split(key, len(dims))
    params = []
    for k, (fin, fout) in zip(keys, dims):
        w = xavier_normal(k, fin, fout)
        b = jnp.zeros((1, fout), dtype=jnp.float32)   # bias zero-init, 2-D
        params.append((w, b))
    return params


def reference_forward(x, params, compute_dtype=jnp.float32):
    """Pure-JAX reference with the same precision recipe as the kernel."""
    (w1, b1), (w2, b2), (w3, b3), (w4, b4) = params
    h = x
    for (w, b) in ((w1, b1), (w2, b2), (w3, b3)):
        h = jnp.dot(h.astype(compute_dtype), w.astype(compute_dtype),
                    preferred_element_type=jnp.float32) + b
        h = jnp.maximum(h, 0.0)
    h = jnp.maximum(jnp.dot(h, w4) + b4, 0.0)   # fc4 stays f32, like the kernel
    s = jax.nn.sigmoid(h)
    return jnp.maximum(s, 0.0)   # trailing relu kept here for spec fidelity


if __name__ == "__main__":
    key = jax.random.PRNGKey(0)
    k_x, k_p = jax.random.split(key)

    B, INPUT_DIM = 200, 32   # non-multiple of tile_b: exercises padding + grid
    x = jax.random.normal(k_x, (B, INPUT_DIM), dtype=jnp.float32)
    params = init_params(k_p, INPUT_DIM)

    # 1) exact f32 path, explicit small tile -> multi-step grid + padded tail
    #    (tight correctness check vs f32 reference).
    out_f32 = jax.block_until_ready(
        baseline_nobatch_forward(x, params, tile_b=128,
                                 compute_dtype=jnp.float32))
    ref_f32 = reference_forward(x, params, jnp.float32)
    assert out_f32.shape == (B, 1), out_f32.shape
    assert jnp.allclose(out_f32, ref_f32, atol=1e-5, rtol=1e-5), \
        "f32 kernel mismatch vs reference"

    # 2) bf16 MXU-input path with the device-aware auto tile (recommended perf
    #    config), checked against a precision-matched reference.
    out_bf16 = jax.block_until_ready(
        baseline_nobatch_forward(x, params, tile_b=None,
                                 compute_dtype=jnp.bfloat16))
    ref_bf16 = reference_forward(x, params, jnp.bfloat16)
    assert out_bf16.shape == (B, 1), out_bf16.shape
    assert jnp.allclose(out_bf16, ref_bf16, atol=2e-3, rtol=2e-3), \
        "bf16 kernel mismatch vs bf16 reference"

    print("KERNEL_OK")
</pallas_src>

<mosaic_0001>
module attributes {stable_mosaic.version = 11 : i64} {
  func.func @mlp_kernel(%arg0: i32, %arg1: memref<128x32xf32, #tpu.memory_space<vmem>>, %arg2: memref<32x512xf32, #tpu.memory_space<vmem>>, %arg3: memref<1x512xf32, #tpu.memory_space<vmem>>, %arg4: memref<512x256xf32, #tpu.memory_space<vmem>>, %arg5: memref<1x256xf32, #tpu.memory_space<vmem>>, %arg6: memref<256x128xf32, #tpu.memory_space<vmem>>, %arg7: memref<1x128xf32, #tpu.memory_space<vmem>>, %arg8: memref<1x128xf32, #tpu.memory_space<vmem>>, %arg9: memref<1x1xf32, #tpu.memory_space<vmem>>, %arg10: memref<1x128xf32, #tpu.memory_space<vmem>>) attributes {dimension_semantics = [#tpu.dimension_semantics<parallel>], iteration_bounds = array<i64: 2>, scalar_prefetch = 0 : i64, scratch_operands = 0 : i64, tpu.core_type = #tpu.core_type<tc>, window_params = [{transform_indices = @transform_0, window_bounds = array<i64: 128, 32>}, {pipeline_mode = #tpu.pipeline_mode<synchronous>, transform_indices = @transform_1, window_bounds = array<i64: 32, 512>}, {pipeline_mode = #tpu.pipeline_mode<synchronous>, transform_indices = @transform_2, window_bounds = array<i64: 1, 512>}, {pipeline_mode = #tpu.pipeline_mode<synchronous>, transform_indices = @transform_3, window_bounds = array<i64: 512, 256>}, {pipeline_mode = #tpu.pipeline_mode<synchronous>, transform_indices = @transform_4, window_bounds = array<i64: 1, 256>}, {pipeline_mode = #tpu.pipeline_mode<synchronous>, transform_indices = @transform_5, window_bounds = array<i64: 256, 128>}, {pipeline_mode = #tpu.pipeline_mode<synchronous>, transform_indices = @transform_6, window_bounds = array<i64: 1, 128>}, {pipeline_mode = #tpu.pipeline_mode<synchronous>, transform_indices = @transform_7, window_bounds = array<i64: 1, 128>}, {pipeline_mode = #tpu.pipeline_mode<synchronous>, transform_indices = @transform_8, window_bounds = array<i64: 1, 1>}, {transform_indices = @transform_9, window_bounds = array<i64: 1, 128>}]} {
    %c0 = arith.constant 0 : index
    %c0_0 = arith.constant 0 : index
    %0 = vector.load %arg1[%c0, %c0_0] : memref<128x32xf32, #tpu.memory_space<vmem>>, vector<128x32xf32>
    %c0_1 = arith.constant 0 : index
    %c0_2 = arith.constant 0 : index
    %1 = vector.load %arg2[%c0_1, %c0_2] : memref<32x512xf32, #tpu.memory_space<vmem>>, vector<32x512xf32>
    %cst = arith.constant dense<0.000000e+00> : vector<128x512xf32>
    %2 = tpu.matmul %0, %1, %cst {dimension_numbers = #tpu.dot_dimension_numbers<[1], [0], [0], [1], [0, 0, 1, 1], [], []>} : vector<128x32xf32>, vector<32x512xf32>, vector<128x512xf32> -> vector<128x512xf32>
    %c0_3 = arith.constant 0 : index
    %c0_4 = arith.constant 0 : index
    %3 = vector.load %arg3[%c0_3, %c0_4] : memref<1x512xf32, #tpu.memory_space<vmem>>, vector<1x512xf32>
    %4 = vector.broadcast %3 : vector<1x512xf32> to vector<128x512xf32>
    %5 = arith.addf %2, %4 : vector<128x512xf32>
    %cst_5 = arith.constant 0.000000e+00 : f32
    %6 = vector.broadcast %cst_5 : f32 to vector<128x512xf32>
    %7 = arith.maximumf %5, %6 : vector<128x512xf32>
    %c0_6 = arith.constant 0 : index
    %c0_7 = arith.constant 0 : index
    %8 = vector.load %arg4[%c0_6, %c0_7] : memref<512x256xf32, #tpu.memory_space<vmem>>, vector<512x256xf32>
    %cst_8 = arith.constant dense<0.000000e+00> : vector<128x256xf32>
    %9 = tpu.matmul %7, %8, %cst_8 {dimension_numbers = #tpu.dot_dimension_numbers<[1], [0], [0], [1], [0, 0, 1, 1], [], []>} : vector<128x512xf32>, vector<512x256xf32>, vector<128x256xf32> -> vector<128x256xf32>
    %c0_9 = arith.constant 0 : index
    %c0_10 = arith.constant 0 : index
    %10 = vector.load %arg5[%c0_9, %c0_10] : memref<1x256xf32, #tpu.memory_space<vmem>>, vector<1x256xf32>
    %11 = vector.broadcast %10 : vector<1x256xf32> to vector<128x256xf32>
    %12 = arith.addf %9, %11 : vector<128x256xf32>
    %cst_11 = arith.constant 0.000000e+00 : f32
    %13 = vector.broadcast %cst_11 : f32 to vector<128x256xf32>
    %14 = arith.maximumf %12, %13 : vector<128x256xf32>
    %c0_12 = arith.constant 0 : index
    %c0_13 = arith.constant 0 : index
    %15 = vector.load %arg6[%c0_12, %c0_13] : memref<256x128xf32, #tpu.memory_space<vmem>>, vector<256x128xf32>
    %cst_14 = arith.constant dense<0.000000e+00> : vector<128x128xf32>
    %16 = tpu.matmul %14, %15, %cst_14 {dimension_numbers = #tpu.dot_dimension_numbers<[1], [0], [0], [1], [0, 0, 1, 1], [], []>} : vector<128x256xf32>, vector<256x128xf32>, vector<128x128xf32> -> vector<128x128xf32>
    %c0_15 = arith.constant 0 : index
    %c0_16 = arith.constant 0 : index
    %17 = vector.load %arg7[%c0_15, %c0_16] : memref<1x128xf32, #tpu.memory_space<vmem>>, vector<1x128xf32>
    %18 = vector.broadcast %17 : vector<1x128xf32> to vector<128x128xf32>
    %19 = arith.addf %16, %18 : vector<128x128xf32>
    %cst_17 = arith.constant 0.000000e+00 : f32
    %20 = vector.broadcast %cst_17 : f32 to vector<128x128xf32>
    %21 = arith.maximumf %19, %20 : vector<128x128xf32>
    %c0_18 = arith.constant 0 : index
    %c0_19 = arith.constant 0 : index
    %22 = vector.load %arg8[%c0_18, %c0_19] : memref<1x128xf32, #tpu.memory_space<vmem>>, vector<1x128xf32>
    %23 = vector.broadcast %22 : vector<1x128xf32> to vector<128x128xf32>
    %24 = arith.mulf %21, %23 : vector<128x128xf32>
    %cst_20 = arith.constant dense<0.000000e+00> : vector<128xf32>
    %25 = vector.multi_reduction <add>, %24, %cst_20 [1] : vector<128x128xf32> to vector<128xf32>
    %26 = vector.shape_cast %25 : vector<128xf32> to vector<128x1xf32>
    %c0_21 = arith.constant 0 : index
    %c0_22 = arith.constant 0 : index
    %27 = vector.load %arg9[%c0_21, %c0_22] : memref<1x1xf32, #tpu.memory_space<vmem>>, vector<1x1xf32>
    %28 = vector.broadcast %27 : vector<1x1xf32> to vector<128x1xf32>
    %29 = arith.addf %26, %28 : vector<128x1xf32>
    %cst_23 = arith.constant 0.000000e+00 : f32
    %30 = vector.broadcast %cst_23 : f32 to vector<128x1xf32>
    %31 = arith.maximumf %29, %30 : vector<128x1xf32>
    %32 = tpu.transpose %31, [1, 0] : vector<128x1xf32> -> vector<1x128xf32>
    %cst_24 = arith.constant 0.000000e+00 : f32
    %33 = vector.broadcast %cst_24 : f32 to vector<1x128xf32>
    %34 = arith.subf %33, %32 : vector<1x128xf32>
    %35 = math.exp %34 : vector<1x128xf32>
    %cst_25 = arith.constant 1.000000e+00 : f32
    %36 = vector.broadcast %cst_25 : f32 to vector<1x128xf32>
    %37 = arith.addf %36, %35 : vector<1x128xf32>
    %38 = tpu.reciprocal %37 : vector<1x128xf32> -> vector<1x128xf32>
    %c0_26 = arith.constant 0 : index
    %c0_27 = arith.constant 0 : index
    %39 = vector.load %arg10[%c0_26, %c0_27] : memref<1x128xf32, #tpu.memory_space<vmem>>, vector<1x128xf32>
    tpu.vector_store %arg10[%c0_26, %c0_27], %38 {strides = array<i32>} : memref<1x128xf32, #tpu.memory_space<vmem>>, vector<1x128xf32>,
    return
  }
  func.func @transform_0(%arg0: i32) -> (i32, i32) {
    %c0_i32 = arith.constant 0 : i32
    %c0_i32_0 = arith.constant 0 : i32
    return %arg0, %c0_i32 : i32, i32
  }
  func.func @transform_1(%arg0: i32) -> (i32, i32) {
    %c0_i32 = arith.constant 0 : i32
    %c0_i32_0 = arith.constant 0 : i32
    %c0_i32_1 = arith.constant 0 : i32
    return %c0_i32, %c0_i32_0 : i32, i32
  }
  func.func @transform_2(%arg0: i32) -> (i32, i32) {
    %c0_i32 = arith.constant 0 : i32
    %c0_i32_0 = arith.constant 0 : i32
    %c0_i32_1 = arith.constant 0 : i32
    return %c0_i32, %c0_i32_0 : i32, i32
  }
  func.func @transform_3(%arg0: i32) -> (i32, i32) {
    %c0_i32 = arith.constant 0 : i32
    %c0_i32_0 = arith.constant 0 : i32
    %c0_i32_1 = arith.constant 0 : i32
    return %c0_i32, %c0_i32_0 : i32, i32
  }
  func.func @transform_4(%arg0: i32) -> (i32, i32) {
    %c0_i32 = arith.constant 0 : i32
    %c0_i32_0 = arith.constant 0 : i32
    %c0_i32_1 = arith.constant 0 : i32
    return %c0_i32, %c0_i32_0 : i32, i32
  }
  func.func @transform_5(%arg0: i32) -> (i32, i32) {
    %c0_i32 = arith.constant 0 : i32
    %c0_i32_0 = arith.constant 0 : i32
    %c0_i32_1 = arith.constant 0 : i32
    return %c0_i32, %c0_i32_0 : i32, i32
  }
  func.func @transform_6(%arg0: i32) -> (i32, i32) {
    %c0_i32 = arith.constant 0 : i32
    %c0_i32_0 = arith.constant 0 : i32
    %c0_i32_1 = arith.constant 0 : i32
    return %c0_i32, %c0_i32_0 : i32, i32
  }
  func.func @transform_7(%arg0: i32) -> (i32, i32) {
    %c0_i32 = arith.constant 0 : i32
    %c0_i32_0 = arith.constant 0 : i32
    %c0_i32_1 = arith.constant 0 : i32
    return %c0_i32, %c0_i32_0 : i32, i32
  }
  func.func @transform_8(%arg0: i32) -> (i32, i32) {
    %c0_i32 = arith.constant 0 : i32
    %c0_i32_0 = arith.constant 0 : i32
    %c0_i32_1 = arith.constant 0 : i32
    return %c0_i32, %c0_i32_0 : i32, i32
  }
  func.func @transform_9(%arg0: i32) -> (i32, i32) {
    %c0_i32 = arith.constant 0 : i32
    %c0_i32_0 = arith.constant 0 : i32
    return %c0_i32, %arg0 : i32, i32
  }
}

</mosaic_0001>

<bundles_post_ra>
// kernel: tpu_custom_call.1
= control target key start
LH: loop header
LB: loop body
LE: loop exit
PB: predicated region body
PF: predicated region fallthrough
CT: control target
= control target key end

     0   :  { %s3490_s0 = inlined_call_operand.vmem [shape: f32[256,32], index: 0, kind: input, shape index: {}]   ;;  %s3491_s1 = inlined_call_operand.hbm [shape: f32[32,512], index: 1, kind: input, shape index: {}]   ;;  %s3492_s2 = inlined_call_operand.vmem [shape: f32[1,512], index: 2, kind: input, shape index: {}]   ;;  %s3493_s3 = inlined_call_operand.hbm [shape: f32[512,256], index: 3, kind: input, shape index: {}]   ;;  %s3494_s4 = inlined_call_operand.vmem [shape: f32[1,256], index: 4, kind: input, shape index: {}]   ;;  %s3495_s5 = inlined_call_operand.vmem [shape: f32[256,128], index: 5, kind: input, shape index: {}]   ;;  %s3496_s6 = inlined_call_operand.vmem [shape: f32[1,128], index: 6, kind: input, shape index: {}]   ;;  %s3497_s7 = inlined_call_operand.vmem [shape: f32[1,128], index: 7, kind: input, shape index: {}]   ;;  %s3498_s8 = inlined_call_operand.<no memory space> [shape: f32[1,1], index: 8, kind: input, shape index: {}]   ;;  %s3499_s9 = inlined_call_operand.hbm [shape: f32[1,256], index: 9, kind: output, shape index: {}]  }
   0x1   :  { %v14_v0 = vstv %s3498_s8 }
   0x2   :  { %15 = vst [vmem:[#allocation2] sm:$0x1] %v14_v0 }
   0x3   :  { %16 = vsyncpa [#allocation4], 0 }
   0x4   :  { %17 = vsyncpa [#allocation7], 0 }
   0x5   :  { %18 = vsyncpa [#allocation5], 0 }
   0x6   :  { %20 = vsyncpa [#allocation5 + $0x1], 0  ;;  %s2226_s11 = smov 0   ;;  %s2228_s12 = smov 0  }
   0x7   :  { %s2230_s13 = smov 0   ;;  %s2232_s14 = smov 0  }
   0x8 LB: > { %s2247_s8 = sadd.s32 4294967295, %s2165_s14   ;;  %s1880_s15 = sadd.s32 4294967294, %s2165_s14   ;;  %s2165_s14 = sphi %s2232_s14, %s3643_s14   ;;  %s2161_s13 = sphi %s2230_s13, %s3642_s13   ;;  %s2157_s12 = sphi %s2228_s12, %s3641_s12   ;;  %s2153_s11 = sphi %s2226_s11, %s3640_s11  }
   0x9   : > { %s2251_s16 = sadd.s32 1, %s2165_s14   ;;  %s227_s17 = sadd.s32 1, %s2161_s13 }
   0xa   : > { %s224_s18 = ssub.s32 %s2165_s14, %s2251_s16  ;;  %p237_p0 = scmp.ne.s32.totalorder %s2161_s13, %s2157_s12 }
   0xb   : > { %p225_p1 = scmp.eq.s32.totalorder %s224_s18, 0  ;;  %p238_p2 = scmp.eq.s32.totalorder %s2247_s8, 1 }
   0xc   : > { %p243_p3 = scmp.ne.s32.totalorder %s2157_s12, %s2153_s11  ;;  %p244_p4 = scmp.eq.s32.totalorder %s1880_s15, 1 }
   0xd   : > { %s2262_s19 = scalar_select %p225_p1, %s2161_s13, %s227_s17  }
   0xe   : > { %p2264_p5 = por %p238_p2, %p237_p0  ;;  %p2268_p6 = por %p244_p4, %p243_p3 }
   0xf   : > { %p1881_p7 = scmp.ge.s32.totalorder %s2165_s14, 1  ;;  %p251_p8 = scmp.lt.s32.totalorder %s2165_s14, 3 }
  0x10   : > { %p1985_p9 = scmp.eq.s32.totalorder %s2247_s8, 0  ;;  %s262_s25 = sshll.u32 %s3491_s1, 4  ;;  %s263_s25 = int_to_ptr.hbm [resolvable:$true] %s262_s25 }
  0x11   : > { %p2275_p10 = pnand %p1881_p7, %p251_p8  ;;  %s2167_s26 = smov [#allocation3]  }
  0x12   : > { %s264_s27 = sshll.u32 %s2167_s26, 4  ;;  %s279_s30 = sshll.u32 %s3493_s3, 4  ;;  %s265_s27 = int_to_ptr.vmem [resolvable:$true] %s264_s27  ;;  %s280_s30 = int_to_ptr.hbm [resolvable:$true] %s279_s30 }
  0x13   : > { %p1974_p11 = pneg %p2275_p10  ;;  %s2168_s10 = smov 512  }
  0x14   : > { %s2169_s15 = smov 32   ;;  %s2170_s17 = smov [#allocation6]  }
  0x15   : > { %p1975_p12 = pnand %p1985_p9, %p1974_p11  ;;  %s281_s18 = sshll.u32 %s2170_s17, 4  ;;  %s282_s18 = int_to_ptr.vmem [resolvable:$true] %s281_s18 }
  0x16   : > { %s2171_s23 = smov 256   ;;  %s2172_s24 = smov 16  }
  0x17   : > { %1977 = dma.hbm_to_vmem [thread:$0]  (!%p1975_p12), %s263_s25, 2048, %s265_s27, [#allocation4], %s2168_s10, %s2168_s10, %s2169_s15  }
  0x18   : > { %1980 = dma.hbm_to_vmem [thread:$0]  (!%p1975_p12), %s280_s30, 16384, %s282_s18, [#allocation7], %s2171_s23, %s2171_s23, %s2172_s24  }
  0x19   : > { %321 = sbr.rel (%p2275_p10) target bundleno = 1000 (0x3e8), region = 56 }
  0x1e   : > { %2140 = dma.done.wait (%p1985_p9), [#allocation4], 2048  }
  0x1f   : > { %2142 = vsyncadd (%p1985_p9), [#allocation4], 4294965248 }
  0x20   : > { %2144 = dma.done.wait (%p1985_p9), [#allocation7], 16384  }
  0x21   : > { %2146 = vsyncadd (%p1985_p9), [#allocation7], 4294950912  ;;  %s1888_s25 = sshll.u32 %s2247_s8, 4  ;;  %v396_v1 = vld [vmem:[#allocation3 + $0x60] sm:$0xff]  ;;  %v397_v2 = vld [vmem:[#allocation3 + $0x68] sm:$0xff]  ;;  %vm410_vm0 = vcmask 261120   ;;  %s1799_s26 = scalar_lea.hbm %s3499_s9, %s2247_s8 }
  0x22   : > { %p363_p13 = scmp.lt.s32.totalorder %s1888_s25, 31  ;;  %v392_v3 = vld [vmem:[#allocation3 + $0x40] sm:$0xff]  ;;  %471 = vmatpush.msra.mxu0 %v396_v1  ;;  %1956 = vmatpush.msra.mxu2 %v396_v1  ;;  %v393_v4 = vld [vmem:[#allocation3 + $0x48] sm:$0xff]  ;;  %v398_v11 = vld [vmem:[#allocation3 + $0x70] sm:$0xff]  ;;  %s360_s24 = sand.u32 1, %s2157_s12  }
  0x23   : > { %536 = vmatpush.msra.mxu1 %v397_v2  ;;  %1960 = vmatpush.msra.mxu3 %v397_v2  ;;  %v388_v5 = vld [vmem:[#allocation3 + $0x20] sm:$0xff]  ;;  %v389_v6 = vld [vmem:[#allocation3 + $0x28] sm:$0xff]  ;;  %v399_v12 = vld [vmem:[#allocation3 + $0x78] sm:$0xff]  ;;  %s361_s27 = scalar_lea.vmem [#allocation8], %s360_s24  ;;  %s1803_s29 = sshll.u32 %s1799_s26, 4  ;;  %s1804_s29 = int_to_ptr.hbm [resolvable:$true] %s1803_s29 }
  0x24   : > { %s3645_s25 = smov (!%p363_p13, %s1888_s25), 31  ;;  %472 = vmatpush.msra.mxu0 %v392_v3  ;;  %1957 = vmatpush.msra.mxu2 %v392_v3  ;;  %v384_v7 = vld [vmem:[#allocation3] sm:$0xff]  ;;  %v385_v8 = vld [vmem:[#allocation3 + $0x8] sm:$0xff]  ;;  %v394_v13 = vld [vmem:[#allocation3 + $0x50] sm:$0xff]  ;;  %s1791_s30 = scalar_lea.sflag [#allocation5], %s360_s24 }
  0x25   : > { %s1889_s22 = sshll.u32 %s3645_s25, 3  ;;  %537 = vmatpush.msra.mxu1 %v393_v4  ;;  %1961 = vmatpush.msra.mxu3 %v393_v4  ;;  %v395_v14 = vld [vmem:[#allocation3 + $0x58] sm:$0xff]  ;;  %v390_v15 = vld [vmem:[#allocation3 + $0x30] sm:$0xff]  ;;  %v875_v33 = vld [vmem:[#allocation6 + $0x2e0] sm:$0xff]  ;;  %s2109_s8 = sshra.s32 %s1804_s29, 4  ;;  %s2110_s8 = int_to_ptr.hbm [resolvable:$true] %s2109_s8 }
  0x26   : > { %s2303_s28 = scalar_lea.vmem %s3490_s0, %s1889_s22  ;;  %473 = vmatpush.msra.mxu0 %v388_v5  ;;  %1958 = vmatpush.msra.mxu2 %v388_v5  ;;  %v391_v16 = vld [vmem:[#allocation3 + $0x38] sm:$0xff]  ;;  %v386_v21 = vld [vmem:[#allocation3 + $0x10] sm:$0xff]  ;;  %v907_v34 = vld [vmem:[#allocation6 + $0x3e0] sm:$0xff]  ;;  %s2111_s10 = scalar_lea.hbm %s2110_s8, 1 }
  0x27   : > { %538 = vmatpush.msra.mxu1 %v389_v6  ;;  %1962 = vmatpush.msra.mxu3 %v389_v6  ;;  %v2306_v9 = vld [vmem:[%s2303_s28] sm:$0xff]  ;;  %v2320_v17 = vld [vmem:[%s2303_s28 + $0x8] sm:$0xff]  ;;  %v2334_v19 = vld [vmem:[%s2303_s28 + $0x10] sm:$0xff]  ;;  %p2112_p0 = scmp.ne.s32.totalorder %s2110_s8, %s2111_s10  ;;  %s2115_s18 = scalar_lea.hbm %s3499_s9, 2 }
  0x28   : > { %v2309_v10 = vld [vmem:[%s2303_s28 + $0x40] sm:$0xff]  ;;  %474 = vmatpush.msra.mxu0 %v384_v7  ;;  %1959 = vmatpush.msra.mxu2 %v384_v7  ;;  %v2323_v18 = vld [vmem:[%s2303_s28 + $0x48] sm:$0xff]  ;;  %v2337_v20 = vld [vmem:[%s2303_s28 + $0x50] sm:$0xff]  ;;  %p2116_p3 = scmp.lt.s32.totalorder %s2110_s8, %s3499_s9  ;;  %p2117_p4 = scmp.lt.s32.totalorder %s2115_s18, %s2111_s10 }
  0x29   : > { %539 = vmatpush.msra.mxu1 %v385_v8  ;;  %1963 = vmatpush.msra.mxu3 %v385_v8  ;;  %v387_v22 = vld [vmem:[#allocation3 + $0x18] sm:$0xff]  ;;  %v2376_v27 = vld [vmem:[%s2303_s28 + $0x28] sm:$0xff]  ;;  %v877_v29 = vld [vmem:[#allocation6 + $0x2f0] sm:$0xff]  ;;  %p2113_p1 = pnand %p2112_p0, %p2264_p5 }
  0x2a   : > { %1890 = vmatmul.msk.f32.vlgmr.msra.gmra.mxu0 %vm410_vm0, %v2306_v9  ;;  %1898 = vmatmul.msk.f32.vlgmr.msra.gmra.mxu2 %vm410_vm0, %v2309_v10  ;;  %v2348_v23 = vld [vmem:[%s2303_s28 + $0x18] sm:$0xff]  ;;  %v2362_v25 = vld [vmem:[%s2303_s28 + $0x20] sm:$0xff]  ;;  %v2379_v28 = vld [vmem:[%s2303_s28 + $0x68] sm:$0xff]  ;;  %p2118_p7 = por %p2117_p4, %p2116_p3 }
  0x2b   : > { %1906 = vmatmul.msk.f32.vlgmr.msra.gmra.mxu1 %vm410_vm0, %v2306_v9  ;;  %1914 = vmatmul.msk.f32.vlgmr.msra.gmra.mxu3 %vm410_vm0, %v2309_v10  ;;  %v2351_v24 = vld [vmem:[%s2303_s28 + $0x58] sm:$0xff]  ;;  %v2365_v26 = vld [vmem:[%s2303_s28 + $0x60] sm:$0xff]  ;;  %v2390_v31 = vld [vmem:[%s2303_s28 + $0x30] sm:$0xff]  ;;  %p2114_p2 = pneg %p2113_p1 }
  0x2c   : > { %601 = vmatpush.msrb.mxu2 %v398_v11  ;;  %666 = vmatpush.msrb.mxu3 %v399_v12  ;;  %v909_v30 = vld [vmem:[#allocation6 + $0x3f0] sm:$0xff]  ;;  %v871_v39 = vld [vmem:[#allocation6 + $0x2c0] sm:$0xff] }
  0x2d   : > { %v2393_v32 = vld [vmem:[%s2303_s28 + $0x70] sm:$0xff]  ;;  %v2404_v35 = vld [vmem:[%s2303_s28 + $0x38] sm:$0xff]  ;;  %v903_v40 = vld [vmem:[#allocation6 + $0x3c0] sm:$0xff]  ;;  %p2119_p8 = pnand %p2118_p7, %p2114_p2 }
  0x2e   : > { %602 = vmatpush.msrb.mxu2 %v394_v13  ;;  %667 = vmatpush.msrb.mxu3 %v395_v14  ;;  %v2407_v36 = vld [vmem:[%s2303_s28 + $0x78] sm:$0xff]  ;;  %v811_v43 = vld [vmem:[#allocation6 + $0xe0] sm:$0xff]  ;;  %s1801_s28 = sshll.u32 %s361_s27, 4  ;;  %s1802_s28 = int_to_ptr.vmem [resolvable:$true] %s1801_s28 }
  0x2f   : > { %v873_v37 = vld [vmem:[#allocation6 + $0x2d0] sm:$0xff]  ;;  %v843_v44 = vld [vmem:[#allocation6 + $0x1e0] sm:$0xff] }
  0x30   : > { %603 = vmatpush.msrb.mxu2 %v390_v15  ;;  %668 = vmatpush.msrb.mxu3 %v391_v16  ;;  %v905_v38 = vld [vmem:[#allocation6 + $0x3d0] sm:$0xff]  ;;  %v807_v48 = vld [vmem:[#allocation6 + $0xc0] sm:$0xff] }
  0x31   : > { %v813_v41 = vld [vmem:[#allocation6 + $0xf0] sm:$0xff]  ;;  %v839_v49 = vld [vmem:[#allocation6 + $0x1c0] sm:$0xff] }
  0x32   : > { %1891 = vmatmul.msk.f32.gmra.mxu0 %vm410_vm0, %v2320_v17  ;;  %1899 = vmatmul.msk.f32.gmra.mxu2 %vm410_vm0, %v2323_v18  ;;  %v845_v42 = vld [vmem:[#allocation6 + $0x1f0] sm:$0xff]  ;;  %v803_v53 = vld [vmem:[#allocation6 + $0xa0] sm:$0xff] }
  0x33   : > { %1907 = vmatmul.msk.f32.gmra.mxu1 %vm410_vm0, %v2320_v17  ;;  %1915 = vmatmul.msk.f32.gmra.mxu3 %vm410_vm0, %v2323_v18  ;;  %v809_v45 = vld [vmem:[#allocation6 + $0xd0] sm:$0xff]  ;;  %v835_v54 = vld [vmem:[#allocation6 + $0x1a0] sm:$0xff] }
  0x34   : > { %604 = vmatpush.msrb.mxu2 %v386_v21  ;;  %669 = vmatpush.msrb.mxu3 %v387_v22  ;;  %v841_v46 = vld [vmem:[#allocation6 + $0x1d0] sm:$0xff]  ;;  %v867_v57 = vld [vmem:[#allocation6 + $0x2a0] sm:$0xff] }
  0x35   : > { %917 = vmatpush.msrb.mxu0 %v813_v41  ;;  %982 = vmatpush.msrb.mxu1 %v845_v42  ;;  %v869_v47 = vld [vmem:[#allocation6 + $0x2b0] sm:$0xff]  ;;  %v799_v58 = vld [vmem:[#allocation6 + $0x80] sm:$0xff] }
  0x36   : > { %1047 = vmatpush.msra.mxu2 %v877_v29  ;;  %1112 = vmatpush.msra.mxu3 %v909_v30  ;;  %v901_v50 = vld [vmem:[#allocation6 + $0x3b0] sm:$0xff]  ;;  %v831_v59 = vld [vmem:[#allocation6 + $0x180] sm:$0xff] }
  0x37   : > { %918 = vmatpush.msrb.mxu0 %v811_v43  ;;  %983 = vmatpush.msrb.mxu1 %v843_v44  ;;  %v805_v51 = vld [vmem:[#allocation6 + $0xb0] sm:$0xff]  ;;  %v899_v60 = vld [vmem:[#allocation6 + $0x3a0] sm:$0xff] }
  0x38   : > { %1048 = vmatpush.msra.mxu2 %v875_v33  ;;  %1113 = vmatpush.msra.mxu3 %v907_v34  ;;  %v837_v52 = vld [vmem:[#allocation6 + $0x1b0] sm:$0xff]  ;;  %v795_v63 = vld [vmem:[#allocation6 + $0x60] sm:$0xff] }
  0x39   : > { %919 = vmatpush.msrb.mxu0 %v809_v45  ;;  %984 = vmatpush.msrb.mxu1 %v841_v46  ;;  %v801_v55 = vld [vmem:[#allocation6 + $0x90] sm:$0xff]  ;;  %v827_v0 = vld [vmem:[#allocation6 + $0x160] sm:$0xff] }
  0x3a   : > { %1892 = vmatmul.msk.f32.gmra.mxu0 %vm410_vm0, %v2334_v19  ;;  %1900 = vmatmul.msk.f32.gmra.mxu2 %vm410_vm0, %v2337_v20  ;;  %v833_v56 = vld [vmem:[#allocation6 + $0x190] sm:$0xff]  ;;  %v791_v4 = vld [vmem:[#allocation6 + $0x40] sm:$0xff] }
  0x3b   : > { %1908 = vmatmul.msk.f32.gmra.mxu1 %vm410_vm0, %v2334_v19  ;;  %1916 = vmatmul.msk.f32.gmra.mxu3 %vm410_vm0, %v2337_v20  ;;  %v797_v61 = vld [vmem:[#allocation6 + $0x70] sm:$0xff]  ;;  %v823_v5 = vld [vmem:[#allocation6 + $0x140] sm:$0xff] }
  0x3c   : > { %1049 = vmatpush.msra.mxu2 %v873_v37  ;;  %1114 = vmatpush.msra.mxu3 %v905_v38  ;;  %v829_v62 = vld [vmem:[#allocation6 + $0x170] sm:$0xff]  ;;  %v819_v11 = vld [vmem:[#allocation6 + $0x120] sm:$0xff] }
  0x3d   : > { %920 = vmatpush.msrb.mxu0 %v807_v48  ;;  %985 = vmatpush.msrb.mxu1 %v839_v49  ;;  %v793_v1 = vld [vmem:[#allocation6 + $0x50] sm:$0xff]  ;;  %v863_v14 = vld [vmem:[#allocation6 + $0x280] sm:$0xff] }
  0x3e   : > { %1050 = vmatpush.msra.mxu2 %v871_v39  ;;  %1115 = vmatpush.msra.mxu3 %v903_v40  ;;  %v825_v2 = vld [vmem:[#allocation6 + $0x150] sm:$0xff]  ;;  %v783_v15 = vld [vmem:[#allocation6] sm:$0xff] }
  0x3f   : > { %921 = vmatpush.msrb.mxu0 %v805_v51  ;;  %986 = vmatpush.msrb.mxu1 %v837_v52  ;;  %v865_v3 = vld [vmem:[#allocation6 + $0x290] sm:$0xff]  ;;  %v815_v16 = vld [vmem:[#allocation6 + $0x100] sm:$0xff] }
  0x40   : > { %1051 = vmatpush.msra.mxu2 %v869_v47  ;;  %1116 = vmatpush.msra.mxu3 %v901_v50  ;;  %v897_v6 = vld [vmem:[#allocation6 + $0x390] sm:$0xff]  ;;  %v859_v22 = vld [vmem:[#allocation6 + $0x260] sm:$0xff] }
  0x41   : > { %922 = vmatpush.msrb.mxu0 %v803_v53  ;;  %987 = vmatpush.msrb.mxu1 %v835_v54  ;;  %v789_v7 = vld [vmem:[#allocation6 + $0x30] sm:$0xff]  ;;  %v855_v40 = vld [vmem:[#allocation6 + $0x240] sm:$0xff] }
  0x42   : > { %1893 = vmatmul.msk.f32.gmra.mxu0 %vm410_vm0, %v2348_v23  ;;  %1901 = vmatmul.msk.f32.gmra.mxu2 %vm410_vm0, %v2351_v24  ;;  %v821_v8 = vld [vmem:[#allocation6 + $0x130] sm:$0xff]  ;;  %v887_v42 = vld [vmem:[#allocation6 + $0x340] sm:$0xff] }
  0x43   : > { %1909 = vmatmul.msk.f32.gmra.mxu1 %vm410_vm0, %v2348_v23  ;;  %1917 = vmatmul.msk.f32.gmra.mxu3 %vm410_vm0, %v2351_v24  ;;  %v785_v12 = vld [vmem:[#allocation6 + $0x10] sm:$0xff] }
  0x44   : > { %923 = vmatpush.msrb.mxu0 %v801_v55  ;;  %988 = vmatpush.msrb.mxu1 %v833_v56  ;;  %v817_v13 = vld [vmem:[#allocation6 + $0x110] sm:$0xff] }
  0x45   : > { %1052 = vmatpush.msra.mxu2 %v867_v57  ;;  %1117 = vmatpush.msra.mxu3 %v899_v60  ;;  %v893_v21 = vld [vmem:[#allocation6 + $0x370] sm:$0xff]  ;;  %v883_v60 = vld [vmem:[#allocation6 + $0x320] sm:$0xff] }
  0x46   : > { %924 = vmatpush.msrb.mxu0 %v799_v58  ;;  %989 = vmatpush.msrb.mxu1 %v831_v59  ;;  %v853_v49 = vld [vmem:[#allocation6 + $0x230] sm:$0xff]  ;;  %v851_v58 = vld [vmem:[#allocation6 + $0x220] sm:$0xff] }
  0x47   : > { %1053 = vmatpush.msra.mxu2 %v865_v3  ;;  %1118 = vmatpush.msra.mxu3 %v897_v6  ;;  %v885_v51 = vld [vmem:[#allocation6 + $0x330] sm:$0xff] }
  0x48   : > { %925 = vmatpush.msrb.mxu0 %v797_v61  ;;  %990 = vmatpush.msrb.mxu1 %v829_v62  ;;  %v849_v3 = vld [vmem:[#allocation6 + $0x210] sm:$0xff] }
  0x49   : > { %1054 = vmatpush.msra.mxu2 %v863_v14 }
  0x4a   : > { %1894 = vmatmul.msk.f32.gmra.mxu0 %vm410_vm0, %v2362_v25  ;;  %1902 = vmatmul.msk.f32.gmra.mxu2 %vm410_vm0, %v2365_v26 }
  0x4b   : > { %1910 = vmatmul.msk.f32.gmra.mxu1 %vm410_vm0, %v2362_v25  ;;  %1918 = vmatmul.msk.f32.gmra.mxu3 %vm410_vm0, %v2365_v26 }
  0x4c   : > { %926 = vmatpush.msrb.mxu0 %v795_v63  ;;  %991 = vmatpush.msrb.mxu1 %v827_v0 }
  0x4e   : > { %927 = vmatpush.msrb.mxu0 %v793_v1  ;;  %992 = vmatpush.msrb.mxu1 %v825_v2 }
  0x50   : > { %928 = vmatpush.msrb.mxu0 %v791_v4  ;;  %993 = vmatpush.msrb.mxu1 %v823_v5  ;;  %v881_v5 = vld [vmem:[#allocation6 + $0x310] sm:$0xff] }
  0x52   : > { %1895 = vmatmul.msk.f32.gmra.mxu0 %vm410_vm0, %v2376_v27  ;;  %1903 = vmatmul.msk.f32.gmra.mxu2 %vm410_vm0, %v2379_v28 }
  0x53   : > { %1911 = vmatmul.msk.f32.gmra.mxu1 %vm410_vm0, %v2376_v27  ;;  %1919 = vmatmul.msk.f32.gmra.mxu3 %vm410_vm0, %v2379_v28 }
  0x54   : > { %929 = vmatpush.msrb.mxu0 %v789_v7  ;;  %994 = vmatpush.msrb.mxu1 %v821_v8  ;;  %v847_v8 = vld [vmem:[#allocation6 + $0x200] sm:$0xff] }
  0x56   : > { %995 = vmatpush.msrb.mxu1 %v819_v11 }
  0x58   : > { %996 = vmatpush.msrb.mxu1 %v817_v13 }
  0x5a   : > { %1896 = vmatmul.msk.f32.gmra.mxu0 %vm410_vm0, %v2390_v31  ;;  %1904 = vmatmul.msk.f32.gmra.mxu2 %vm410_vm0, %v2393_v32 }
  0x5b   : > { %1912 = vmatmul.msk.f32.gmra.mxu1 %vm410_vm0, %v2390_v31  ;;  %1920 = vmatmul.msk.f32.gmra.mxu3 %vm410_vm0, %v2393_v32 }
  0x5c   : > { %997 = vmatpush.msrb.mxu1 %v815_v16 }
  0x62   : > { %1897 = vmatmul.msk.f32.gmra.mxu0 %vm410_vm0, %v2404_v35  ;;  %1905 = vmatmul.msk.f32.gmra.mxu2 %vm410_vm0, %v2407_v36 }
  0x63   : > { %1913 = vmatmul.msk.f32.gmra.mxu1 %vm410_vm0, %v2404_v35  ;;  %1921 = vmatmul.msk.f32.gmra.mxu3 %vm410_vm0, %v2407_v36 }
  0x6a   : > { %1922 = vmatmul.msk.f32.vlgmr.msrb.gmra.mxu2 %vm410_vm0, %v2306_v9 }
  0x6b   : > { %1938 = vmatmul.msk.f32.vlgmr.msrb.gmra.mxu3 %vm410_vm0, %v2306_v9  ;;  %v787_v9 = vld [vmem:[#allocation6 + $0x20] sm:$0xff] }
  0x6c   : > { %930 = vmatpush.msrb.mxu0 %v787_v9 }
  0x6e   : > { %931 = vmatpush.msrb.mxu0 %v785_v12 }
  0x70   : > { %932 = vmatpush.msrb.mxu0 %v783_v15  ;;  %v879_v15 = vld [vmem:[#allocation6 + $0x300] sm:$0xff] }
  0x72   : > { %1923 = vmatmul.msk.f32.gmra.mxu2 %vm410_vm0, %v2320_v17 }
  0x73   : > { %1939 = vmatmul.msk.f32.gmra.mxu3 %vm410_vm0, %v2320_v17  ;;  %v895_v17 = vld [vmem:[#allocation6 + $0x380] sm:$0xff] }
  0x74   : > { %1119 = vmatpush.msra.mxu3 %v895_v17 }
  0x76   : > { %1120 = vmatpush.msra.mxu3 %v893_v21 }
  0x7a   : > { %1924 = vmatmul.msk.f32.gmra.mxu2 %vm410_vm0, %v2334_v19 }
  0x7b   : > { %1940 = vmatmul.msk.f32.gmra.mxu3 %vm410_vm0, %v2334_v19  ;;  %v861_v19 = vld [vmem:[#allocation6 + $0x270] sm:$0xff] }
  0x7c   : > { %1055 = vmatpush.msra.mxu2 %v861_v19 }
  0x7e   : > { %1056 = vmatpush.msra.mxu2 %v859_v22 }
  0x82   : > { %1925 = vmatmul.msk.f32.gmra.mxu2 %vm410_vm0, %v2348_v23 }
  0x83   : > { %1941 = vmatmul.msk.f32.gmra.mxu3 %vm410_vm0, %v2348_v23  ;;  %v891_v23 = vld [vmem:[#allocation6 + $0x360] sm:$0xff] }
  0x84   : > { %1121 = vmatpush.msra.mxu3 %v891_v23 }
  0x8a   : > { %1926 = vmatmul.msk.f32.gmra.mxu2 %vm410_vm0, %v2362_v25 }
  0x8b   : > { %1942 = vmatmul.msk.f32.gmra.mxu3 %vm410_vm0, %v2362_v25  ;;  %v2448_v25 = vld [vmem:[%s3492_s2] sm:$0xf] }
  0x8c   : > { %v2455_v29 = vperm.slane %v2448_v25, 0  ;;  %v2458_v30 = vperm.slane %v2448_v25, 1 }
  0x92   : > { %1927 = vmatmul.msk.f32.gmra.mxu2 %vm410_vm0, %v2376_v27 }
  0x93   : > { %1943 = vmatmul.msk.f32.gmra.mxu3 %vm410_vm0, %v2376_v27  ;;  %v857_v27 = vld [vmem:[#allocation6 + $0x250] sm:$0xff] }
  0x94   : > { %1057 = vmatpush.msra.mxu2 %v857_v27  ;;  %v878_v27 = vld [vmem:[#allocation6 + $0x2f8] sm:$0xff] }
  0x96   : > { %1058 = vmatpush.msra.mxu2 %v855_v40 }
  0x98   : > { %1059 = vmatpush.msra.mxu2 %v853_v49  ;;  %v846_v49 = vld [vmem:[#allocation6 + $0x1f8] sm:$0xff] }
  0x99   : > { %1242 = vmatpush.msra.mxu1 %v846_v49 }
  0x9a   : > { %1928 = vmatmul.msk.f32.gmra.mxu2 %vm410_vm0, %v2390_v31 }
  0x9b   : > { %1944 = vmatmul.msk.f32.gmra.mxu3 %vm410_vm0, %v2390_v31  ;;  %v889_v31 = vld [vmem:[#allocation6 + $0x350] sm:$0xff]  ;;  %1060 = vmatpush.msra.mxu2 %v851_v58 }
  0x9c   : > { %1122 = vmatpush.msra.mxu3 %v889_v31 }
  0x9d   : > { %1061 = vmatpush.msra.mxu2 %v849_v3 }
  0x9e   : > { %1123 = vmatpush.msra.mxu3 %v887_v42 }
  0x9f   : > { %1062 = vmatpush.msra.mxu2 %v847_v8  ;;  %v844_v8 = vld [vmem:[#allocation6 + $0x1e8] sm:$0xff] }
  0xa0   : > { %1124 = vmatpush.msra.mxu3 %v885_v51  ;;  %1243 = vmatpush.msra.mxu1 %v844_v8 }
  0xa1   : > { %1307 = vmatpush.msrb.mxu2 %v878_v27  ;;  %v810_v27 = vld [vmem:[#allocation6 + $0xd8] sm:$0xff] }
  0xa2   : > { %1929 = vmatmul.msk.f32.gmra.mxu2 %vm410_vm0, %v2404_v35  ;;  %1125 = vmatpush.msra.mxu3 %v883_v60  ;;  %v812_v60 = vld [vmem:[#allocation6 + $0xe8] sm:$0xff] }
  0xa3   : > { %1945 = vmatmul.msk.f32.gmra.mxu3 %vm410_vm0, %v2404_v35 }
  0xa4   : > { %1126 = vmatpush.msra.mxu3 %v881_v5 }
  0xa6   : > { %1127 = vmatpush.msra.mxu3 %v879_v15 }
  0xa7   : > { %v476_v33 = vpop.f32.mrf.mxu0 }
  0xa8   : > { %v2461_v34 = vadd.f32 %v476_v33, %v2455_v29  ;;  %v541_v37 = vpop.f32.mrf.mxu1  ;;  %v814_v33 = vld [vmem:[#allocation6 + $0xf8] sm:$0xff] }
  0xa9   : > { %v2464_v38 = vadd.f32 %v541_v37, %v2458_v30  ;;  %v910_v37 = vld [vmem:[#allocation6 + $0x3f8] sm:$0xff]  ;;  %1177 = vmatpush.msra.mxu0 %v814_v33 }
  0xaa   : > { %v719_v35 = vmax.f32 %v2461_v34, 0.0  ;;  %1930 = vmatmul.msk.f32.gmra.mxu2 %vm410_vm0, %v2309_v10  ;;  %1372 = vmatpush.msrb.mxu3 %v910_v37  ;;  %v906_v33 = vld [vmem:[#allocation6 + $0x3d8] sm:$0xff] }
  0xab   : > { %v720_v39 = vmax.f32 %v2464_v38, 0.0  ;;  %1946 = vmatmul.msk.f32.gmra.mxu3 %vm410_vm0, %v2309_v10  ;;  %1178 = vmatpush.msra.mxu0 %v812_v60 }
  0xac   : > { %933 = vmatmul.f32.vlgmr.msrb.gmra.mxu0 %v719_v35 }
  0xad   : > { %998 = vmatmul.f32.vlgmr.msrb.gmra.mxu1 %v720_v39  ;;  %v2476_v41 = vpop.f32.mrf.mxu2  ;;  %1179 = vmatpush.msra.mxu0 %v810_v27 }
  0xae   : > { %v2478_v43 = vpop.f32.mrf.mxu3  ;;  %v2620_v37 = vadd.f32 %v2476_v41, %v2455_v29  ;;  %v2634_v41 = vperm.slane %v2448_v25, 3 }
  0xaf   : > { %v479_v44 = vpop.f32.mrf.mxu0 }
  0xb0   : > { %v2481_v45 = vadd.f32 %v479_v44, %v2455_v29  ;;  %v544_v46 = vpop.f32.mrf.mxu1  ;;  %v3503_v49 = vmax.f32 %v2620_v37, 0.0 }
  0xb1   : > { %v2484_v10 = vadd.f32 %v544_v46, %v2458_v30 }
  0xb2   : > { %1931 = vmatmul.msk.f32.gmra.mxu2 %vm410_vm0, %v2323_v18  ;;  %v723_v47 = vmax.f32 %v2481_v45, 0.0 }
  0xb3   : > { %1947 = vmatmul.msk.f32.gmra.mxu3 %vm410_vm0, %v2323_v18  ;;  %v724_v48 = vmax.f32 %v2484_v10, 0.0  ;;  %v852_v10 = vld [vmem:[#allocation6 + $0x228] sm:$0xff] }
  0xb4   : > { %936 = vmatmul.f32.gmra.mxu0 %v723_v47 }
  0xb5   : > { %1001 = vmatmul.f32.gmra.mxu1 %v724_v48  ;;  %v2496_v50 = vpop.f32.mrf.mxu2 }
  0xb6   : > { %v2498_v52 = vpop.f32.mrf.mxu3  ;;  %v2642_v8 = vadd.f32 %v2496_v50, %v2455_v29 }
  0xb7   : > { %v482_v53 = vpop.f32.mrf.mxu0  ;;  %v2649_v27 = vadd.f32 %v2498_v52, %v2458_v30 }
  0xb8   : > { %v2501_v54 = vadd.f32 %v482_v53, %v2455_v29  ;;  %v547_v18 = vpop.f32.mrf.mxu1  ;;  %v3505_v50 = vmax.f32 %v2642_v8, 0.0 }
  0xb9   : > { %v2504_v55 = vadd.f32 %v547_v18, %v2458_v30  ;;  %v876_v18 = vld [vmem:[#allocation6 + $0x2e8] sm:$0xff]  ;;  %v3504_v52 = vmax.f32 %v2649_v27, 0.0 }
  0xba   : > { %1932 = vmatmul.msk.f32.gmra.mxu2 %vm410_vm0, %v2337_v20  ;;  %v727_v56 = vmax.f32 %v2501_v54, 0.0 }
  0xbb   : > { %1948 = vmatmul.msk.f32.gmra.mxu3 %vm410_vm0, %v2337_v20  ;;  %v728_v57 = vmax.f32 %v2504_v55, 0.0  ;;  %1308 = vmatpush.msrb.mxu2 %v876_v18  ;;  %v2630_v18 = vperm.slane %v2448_v25, 2 }
  0xbc   : > { %939 = vmatmul.f32.gmra.mxu0 %v727_v56 }
  0xbd   : > { %1004 = vmatmul.f32.gmra.mxu1 %v728_v57  ;;  %v2516_v59 = vpop.f32.mrf.mxu2 }
  0xbe   : > { %v2518_v61 = vpop.f32.mrf.mxu3 }
  0xbf   : > { %v485_v62 = vpop.f32.mrf.mxu0 }
  0xc0   : > { %v2521_v63 = vadd.f32 %v485_v62, %v2455_v29  ;;  %v550_v20 = vpop.f32.mrf.mxu1  ;;  %v908_v62 = vld [vmem:[#allocation6 + $0x3e8] sm:$0xff] }
  0xc1   : > { %v2524_v0 = vadd.f32 %v550_v20, %v2458_v30  ;;  %1373 = vmatpush.msrb.mxu3 %v908_v62  ;;  %v872_v62 = vld [vmem:[#allocation6 + $0x2c8] sm:$0xff] }
  0xc2   : > { %1933 = vmatmul.msk.f32.gmra.mxu2 %vm410_vm0, %v2351_v24  ;;  %v3537_v1 = vmax.f32 %v2521_v63, 0.0  ;;  %v3571_v55 = vmax.f32 %v2521_v63, 0.0 }
  0xc3   : > { %1949 = vmatmul.msk.f32.gmra.mxu3 %vm410_vm0, %v2351_v24  ;;  %v3532_v2 = vmax.f32 %v2524_v0, 0.0 }
  0xc4   : > { %942 = vmatmul.f32.gmra.mxu0 %v3537_v1  ;;  %1374 = vmatpush.msrb.mxu3 %v906_v33 }
  0xc5   : > { %1007 = vmatmul.f32.gmra.mxu1 %v3532_v2  ;;  %v2536_v4 = vpop.f32.mrf.mxu2 }
  0xc6   : > { %v2538_v6 = vpop.f32.mrf.mxu3 }
  0xc7   : > { %v488_v7 = vpop.f32.mrf.mxu0 }
  0xc8   : > { %v2541_v24 = vadd.f32 %v488_v7, %v2455_v29  ;;  %v553_v9 = vpop.f32.mrf.mxu1 }
  0xc9   : > { %v2544_v11 = vadd.f32 %v553_v9, %v2458_v30 }
  0xca   : > { %1934 = vmatmul.msk.f32.gmra.mxu2 %vm410_vm0, %v2365_v26  ;;  %v3522_v12 = vmax.f32 %v2541_v24, 0.0 }
  0xcb   : > { %1950 = vmatmul.msk.f32.gmra.mxu3 %vm410_vm0, %v2365_v26  ;;  %v3518_v13 = vmax.f32 %v2544_v11, 0.0 }
  0xcc   : > { %945 = vmatmul.f32.gmra.mxu0 %v3522_v12 }
  0xcd   : > { %1010 = vmatmul.f32.gmra.mxu1 %v3518_v13  ;;  %v2556_v14 = vpop.f32.mrf.mxu2 }
  0xce   : > { %v2558_v16 = vpop.f32.mrf.mxu3 }
  0xcf   : > { %v491_v17 = vpop.f32.mrf.mxu0 }
  0xd0   : > { %v2561_v19 = vadd.f32 %v491_v17, %v2455_v29  ;;  %v556_v21 = vpop.f32.mrf.mxu1  ;;  %v874_v17 = vld [vmem:[#allocation6 + $0x2d8] sm:$0xff] }
  0xd1   : > { %v2564_v26 = vadd.f32 %v556_v21, %v2458_v30  ;;  %1309 = vmatpush.msrb.mxu2 %v874_v17 }
  0xd2   : > { %1935 = vmatmul.msk.f32.gmra.mxu2 %vm410_vm0, %v2379_v28  ;;  %v3515_v22 = vmax.f32 %v2561_v19, 0.0 }
  0xd3   : > { %1951 = vmatmul.msk.f32.gmra.mxu3 %vm410_vm0, %v2379_v28  ;;  %v3514_v23 = vmax.f32 %v2564_v26, 0.0  ;;  %1310 = vmatpush.msrb.mxu2 %v872_v62 }
  0xd4   : > { %948 = vmatmul.f32.gmra.mxu0 %v3515_v22  ;;  %v826_v22 = vld [vmem:[#allocation6 + $0x158] sm:$0xff] }
  0xd5   : > { %1013 = vmatmul.f32.gmra.mxu1 %v3514_v23  ;;  %v2576_v31 = vpop.f32.mrf.mxu2 }
  0xd6   : > { %v2578_v40 = vpop.f32.mrf.mxu3  ;;  %v2746_v12 = vadd.f32 %v2576_v31, %v2455_v29 }
  0xd7   : > { %v494_v42 = vpop.f32.mrf.mxu0 }
  0xd8   : > { %v2581_v28 = vadd.f32 %v494_v42, %v2455_v29  ;;  %v559_v44 = vpop.f32.mrf.mxu1 }
  0xd9   : > { %v2584_v46 = vadd.f32 %v559_v44, %v2458_v30  ;;  %v842_v44 = vld [vmem:[#allocation6 + $0x1d8] sm:$0xff] }
  0xda   : > { %1936 = vmatmul.msk.f32.gmra.mxu2 %vm410_vm0, %v2393_v32  ;;  %v3511_v51 = vmax.f32 %v2581_v28, 0.0  ;;  %1244 = vmatpush.msra.mxu1 %v842_v44 }
  0xdb   : > { %1952 = vmatmul.msk.f32.gmra.mxu3 %vm410_vm0, %v2393_v32  ;;  %v3508_v53 = vmax.f32 %v2584_v46, 0.0 }
  0xdc   : > { %951 = vmatmul.f32.gmra.mxu0 %v3511_v51 }
  0xdd   : > { %1016 = vmatmul.f32.gmra.mxu1 %v3508_v53  ;;  %v2596_v58 = vpop.f32.mrf.mxu2  ;;  %v834_v53 = vld [vmem:[#allocation6 + $0x198] sm:$0xff] }
  0xde   : > { %v2598_v20 = vpop.f32.mrf.mxu3 }
  0xdf   : > { %v497_v3 = vpop.f32.mrf.mxu0 }
  0xe0   : > { %v2601_v32 = vadd.f32 %v497_v3, %v2455_v29  ;;  %v562_v5 = vpop.f32.mrf.mxu1  ;;  %v808_v3 = vld [vmem:[#allocation6 + $0xc8] sm:$0xff] }
  0xe1   : > { %v2604_v7 = vadd.f32 %v562_v5, %v2458_v30  ;;  %v904_v5 = vld [vmem:[#allocation6 + $0x3c8] sm:$0xff]  ;;  %1180 = vmatpush.msra.mxu0 %v808_v3 }
  0xe2   : > { %1937 = vmatmul.msk.f32.gmra.mxu2 %vm410_vm0, %v2407_v36  ;;  %v3507_v9 = vmax.f32 %v2601_v32, 0.0  ;;  %1375 = vmatpush.msrb.mxu3 %v904_v5  ;;  %v806_v5 = vld [vmem:[#allocation6 + $0xb8] sm:$0xff] }
  0xe3   : > { %1953 = vmatmul.msk.f32.gmra.mxu3 %vm410_vm0, %v2407_v36  ;;  %v3506_v15 = vmax.f32 %v2604_v7, 0.0  ;;  %v2626_v36 = vadd.f32 %v2478_v43, %v2458_v30  ;;  %1181 = vmatpush.msra.mxu0 %v806_v5  ;;  %v800_v5 = vld [vmem:[#allocation6 + $0x88] sm:$0xff] }
  0xe4   : > { %954 = vmatmul.f32.gmra.mxu0 %v3507_v9 }
  0xe5   : > { %1019 = vmatmul.f32.gmra.mxu1 %v3506_v15  ;;  %v2616_v21 = vpop.f32.mrf.mxu2  ;;  %v3500_v60 = vmax.f32 %v2626_v36, 0.0  ;;  %v836_v15 = vld [vmem:[#allocation6 + $0x1a8] sm:$0xff] }
  0xe6   : > { %v2622_v42 = vpop.f32.mrf.mxu3 }
  0xe7   : > { %v2805_v2 = vadd.f32 %v2622_v42, %v2458_v30 }
  0xec   : > { %957 = vmatmul.f32.gmra.mxu0 %v3503_v49 }
  0xed   : > { %1022 = vmatmul.f32.gmra.mxu1 %v3500_v60  ;;  %v606_v43 = vpop.f32.mrf.mxu2  ;;  %v840_v60 = vld [vmem:[#allocation6 + $0x1c8] sm:$0xff] }
  0xee   : > { %v2645_v17 = vadd.f32 %v606_v43, %v2630_v18  ;;  %v671_v25 = vpop.f32.mrf.mxu3  ;;  %1245 = vmatpush.msra.mxu1 %v840_v60  ;;  %v870_v43 = vld [vmem:[#allocation6 + $0x2b8] sm:$0xff]  ;;  %v2668_v60 = vadd.f32 %v2516_v59, %v2455_v29 }
  0xef   : > { %v2652_v33 = vadd.f32 %v671_v25, %v2634_v41  ;;  %1311 = vmatpush.msrb.mxu2 %v870_v43  ;;  %v902_v25 = vld [vmem:[#allocation6 + $0x3b8] sm:$0xff]  ;;  %v2675_v43 = vadd.f32 %v2518_v61, %v2458_v30 }
  0xf0   : > { %v3501_v44 = vmax.f32 %v2645_v17, 0.0  ;;  %1376 = vmatpush.msrb.mxu3 %v902_v25  ;;  %v3513_v61 = vmax.f32 %v2668_v60, 0.0  ;;  %v900_v25 = vld [vmem:[#allocation6 + $0x3a8] sm:$0xff] }
  0xf1   : > { %v3502_v62 = vmax.f32 %v2652_v33, 0.0 }
  0xf2   : > { %1063 = vmatmul.f32.vlgmr.msra.gmra.mxu2 %v3501_v44  ;;  %v838_v44 = vld [vmem:[#allocation6 + $0x1b8] sm:$0xff]  ;;  %1377 = vmatpush.msrb.mxu3 %v900_v25  ;;  %v792_v25 = vld [vmem:[#allocation6 + $0x48] sm:$0xff] }
  0xf3   : > { %1128 = vmatmul.f32.vlgmr.msra.gmra.mxu3 %v3502_v62  ;;  %1246 = vmatpush.msra.mxu1 %v838_v44  ;;  %v868_v44 = vld [vmem:[#allocation6 + $0x2a8] sm:$0xff] }
  0xf4   : > { %960 = vmatmul.f32.gmra.mxu0 %v3505_v50  ;;  %v804_v50 = vld [vmem:[#allocation6 + $0xa8] sm:$0xff]  ;;  %1312 = vmatpush.msrb.mxu2 %v868_v44  ;;  %v2701_v44 = vadd.f32 %v2538_v6, %v2458_v30 }
  0xf5   : > { %1025 = vmatmul.f32.gmra.mxu1 %v3504_v52  ;;  %v609_v3 = vpop.f32.mrf.mxu2  ;;  %1182 = vmatpush.msra.mxu0 %v804_v50  ;;  %v832_v50 = vld [vmem:[#allocation6 + $0x188] sm:$0xff] }
  0xf6   : > { %v2671_v62 = vadd.f32 %v609_v3, %v2630_v18  ;;  %v674_v49 = vpop.f32.mrf.mxu3  ;;  %1247 = vmatpush.msra.mxu1 %v836_v15  ;;  %v802_v3 = vld [vmem:[#allocation6 + $0x98] sm:$0xff] }
  0xf7   : > { %v2678_v52 = vadd.f32 %v674_v49, %v2634_v41  ;;  %1183 = vmatpush.msra.mxu0 %v802_v3  ;;  %v3512_v49 = vmax.f32 %v2675_v43, 0.0  ;;  %v798_v3 = vld [vmem:[#allocation6 + $0x78] sm:$0xff] }
  0xf8   : > { %v3509_v9 = vmax.f32 %v2671_v62, 0.0  ;;  %1248 = vmatpush.msra.mxu1 %v834_v53 }
  0xf9   : > { %v3510_v59 = vmax.f32 %v2678_v52, 0.0  ;;  %1184 = vmatpush.msra.mxu0 %v800_v5  ;;  %v796_v5 = vld [vmem:[#allocation6 + $0x68] sm:$0xff] }
  0xfa   : > { %1066 = vmatmul.f32.gmra.mxu2 %v3509_v9  ;;  %v830_v9 = vld [vmem:[#allocation6 + $0x178] sm:$0xff]  ;;  %1249 = vmatpush.msra.mxu1 %v832_v50 }
  0xfb   : > { %1131 = vmatmul.f32.gmra.mxu3 %v3510_v59  ;;  %v2694_v59 = vadd.f32 %v2536_v4, %v2455_v29  ;;  %1185 = vmatpush.msra.mxu0 %v798_v3  ;;  %v866_v50 = vld [vmem:[#allocation6 + $0x298] sm:$0xff] }
  0xfc   : > { %963 = vmatmul.f32.gmra.mxu0 %v3513_v61  ;;  %v828_v61 = vld [vmem:[#allocation6 + $0x168] sm:$0xff]  ;;  %1250 = vmatpush.msra.mxu1 %v830_v9 }
  0xfd   : > { %1028 = vmatmul.f32.gmra.mxu1 %v3512_v49  ;;  %v612_v15 = vpop.f32.mrf.mxu2  ;;  %1186 = vmatpush.msra.mxu0 %v796_v5  ;;  %v3520_v6 = vmax.f32 %v2694_v59, 0.0  ;;  %v824_v9 = vld [vmem:[#allocation6 + $0x148] sm:$0xff]  ;;  %v898_v5 = vld [vmem:[#allocation6 + $0x398] sm:$0xff] }
  0xfe   : > { %v2697_v53 = vadd.f32 %v612_v15, %v2630_v18  ;;  %v677_v51 = vpop.f32.mrf.mxu3  ;;  %v794_v15 = vld [vmem:[#allocation6 + $0x58] sm:$0xff]  ;;  %1251 = vmatpush.msra.mxu1 %v828_v61  ;;  %1313 = vmatpush.msrb.mxu2 %v866_v50  ;;  %v788_v50 = vld [vmem:[#allocation6 + $0x28] sm:$0xff] }
  0xff   : > { %v2704_v49 = vadd.f32 %v677_v51, %v2634_v41  ;;  %v3519_v51 = vmax.f32 %v2701_v44, 0.0  ;;  %1187 = vmatpush.msra.mxu0 %v794_v15  ;;  %v790_v61 = vld [vmem:[#allocation6 + $0x38] sm:$0xff]  ;;  %1378 = vmatpush.msrb.mxu3 %v898_v5  ;;  %v784_v5 = vld [vmem:[#allocation6 + $0x8] sm:$0xff] }
 0x100   : > { %v3516_v23 = vmax.f32 %v2697_v53, 0.0  ;;  %1252 = vmatpush.msra.mxu1 %v826_v22  ;;  %v2727_v22 = vadd.f32 %v2558_v16, %v2458_v30  ;;  %v786_v16 = vld [vmem:[#allocation6 + $0x18] sm:$0xff] }
 0x101   : > { %v3517_v4 = vmax.f32 %v2704_v49, 0.0  ;;  %1188 = vmatpush.msra.mxu0 %v792_v25 }
 0x102   : > { %1069 = vmatmul.f32.gmra.mxu2 %v3516_v23  ;;  %v822_v23 = vld [vmem:[#allocation6 + $0x138] sm:$0xff]  ;;  %1253 = vmatpush.msra.mxu1 %v824_v9 }
 0x103   : > { %1134 = vmatmul.f32.gmra.mxu3 %v3517_v4  ;;  %v2720_v4 = vadd.f32 %v2556_v14, %v2455_v29  ;;  %1189 = vmatpush.msra.mxu0 %v790_v61  ;;  %v820_v14 = vld [vmem:[#allocation6 + $0x128] sm:$0xff]  ;;  %v818_v9 = vld [vmem:[#allocation6 + $0x118] sm:$0xff] }
 0x104   : > { %966 = vmatmul.f32.gmra.mxu0 %v3520_v6  ;;  %1254 = vmatpush.msra.mxu1 %v822_v23  ;;  %v864_v23 = vld [vmem:[#allocation6 + $0x288] sm:$0xff] }
 0x105   : > { %1031 = vmatmul.f32.gmra.mxu1 %v3519_v51  ;;  %v615_v3 = vpop.f32.mrf.mxu2  ;;  %v3524_v25 = vmax.f32 %v2720_v4, 0.0  ;;  %1190 = vmatpush.msra.mxu0 %v788_v50  ;;  %v896_v50 = vld [vmem:[#allocation6 + $0x388] sm:$0xff] }
 0x106   : > { %v2723_v15 = vadd.f32 %v615_v3, %v2630_v18  ;;  %v680_v13 = vpop.f32.mrf.mxu3  ;;  %1255 = vmatpush.msra.mxu1 %v820_v14  ;;  %1314 = vmatpush.msrb.mxu2 %v864_v23  ;;  %v862_v23 = vld [vmem:[#allocation6 + $0x278] sm:$0xff] }
 0x107   : > { %v2730_v51 = vadd.f32 %v680_v13, %v2634_v41  ;;  %v3525_v13 = vmax.f32 %v2727_v22, 0.0  ;;  %1191 = vmatpush.msra.mxu0 %v786_v16  ;;  %1379 = vmatpush.msrb.mxu3 %v896_v50 }
 0x108   : > { %v3521_v6 = vmax.f32 %v2723_v15, 0.0  ;;  %1256 = vmatpush.msra.mxu1 %v818_v9  ;;  %v3527_v9 = vmax.f32 %v2746_v12, 0.0  ;;  %1315 = vmatpush.msrb.mxu2 %v862_v23 }
 0x109   : > { %v3523_v3 = vmax.f32 %v2730_v51, 0.0  ;;  %1192 = vmatpush.msra.mxu0 %v784_v5  ;;  %v894_v5 = vld [vmem:[#allocation6 + $0x378] sm:$0xff] }
 0x10a   : > { %1072 = vmatmul.f32.gmra.mxu2 %v3521_v6  ;;  %v816_v6 = vld [vmem:[#allocation6 + $0x108] sm:$0xff]  ;;  %1380 = vmatpush.msrb.mxu3 %v894_v5 }
 0x10b   : > { %1137 = vmatmul.f32.gmra.mxu3 %v3523_v3  ;;  %1257 = vmatpush.msra.mxu1 %v816_v6 }
 0x10c   : > { %969 = vmatmul.f32.gmra.mxu0 %v3524_v25  ;;  %v2753_v25 = vadd.f32 %v2578_v40, %v2458_v30 }
 0x10d   : > { %1034 = vmatmul.f32.gmra.mxu1 %v3525_v13  ;;  %v618_v61 = vpop.f32.mrf.mxu2 }
 0x10e   : > { %v2749_v3 = vadd.f32 %v618_v61, %v2630_v18  ;;  %v683_v14 = vpop.f32.mrf.mxu3  ;;  %v3528_v40 = vmax.f32 %v2753_v25, 0.0  ;;  %v2772_v61 = vadd.f32 %v2596_v58, %v2455_v29 }
 0x10f   : > { %v2756_v13 = vadd.f32 %v683_v14, %v2634_v41 }
 0x110   : > { %v3530_v16 = vmax.f32 %v2749_v3, 0.0  ;;  %v3533_v58 = vmax.f32 %v2772_v61, 0.0 }
 0x111   : > { %v3526_v31 = vmax.f32 %v2756_v13, 0.0 }
 0x112   : > { %1075 = vmatmul.f32.gmra.mxu2 %v3530_v16 }
 0x113   : > { %1140 = vmatmul.f32.gmra.mxu3 %v3526_v31  ;;  %v2779_v31 = vadd.f32 %v2598_v20, %v2458_v30  ;;  %v860_v20 = vld [vmem:[#allocation6 + $0x268] sm:$0xff]  ;;  %v858_v30 = vld [vmem:[#allocation6 + $0x258] sm:$0xff] }
 0x114   : > { %972 = vmatmul.f32.gmra.mxu0 %v3527_v9  ;;  %1316 = vmatpush.msrb.mxu2 %v860_v20 }
 0x115   : > { %1037 = vmatmul.f32.gmra.mxu1 %v3528_v40  ;;  %v621_v6 = vpop.f32.mrf.mxu2 }
 0x116   : > { %v2775_v50 = vadd.f32 %v621_v6, %v2630_v18  ;;  %v686_v14 = vpop.f32.mrf.mxu3  ;;  %v3534_v6 = vmax.f32 %v2779_v31, 0.0  ;;  %1317 = vmatpush.msrb.mxu2 %v858_v30  ;;  %v856_v30 = vld [vmem:[#allocation6 + $0x248] sm:$0xff] }
 0x117   : > { %v2782_v9 = vadd.f32 %v686_v14, %v2634_v41  ;;  %v892_v14 = vld [vmem:[#allocation6 + $0x368] sm:$0xff] }
 0x118   : > { %v3529_v40 = vmax.f32 %v2775_v50, 0.0  ;;  %1381 = vmatpush.msrb.mxu3 %v892_v14  ;;  %1318 = vmatpush.msrb.mxu2 %v856_v30  ;;  %v886_v30 = vld [vmem:[#allocation6 + $0x338] sm:$0xff] }
 0x119   : > { %v3531_v23 = vmax.f32 %v2782_v9, 0.0 }
 0x11a   : > { %1078 = vmatmul.f32.gmra.mxu2 %v3529_v40  ;;  %v2798_v40 = vadd.f32 %v2616_v21, %v2455_v29  ;;  %v3539_v21 = vmax.f32 %v2805_v2, 0.0 }
 0x11b   : > { %1143 = vmatmul.f32.gmra.mxu3 %v3531_v23 }
 0x11c   : > { %975 = vmatmul.f32.gmra.mxu0 %v3533_v58  ;;  %v3538_v29 = vmax.f32 %v2798_v40, 0.0 }
 0x11d   : > { %1040 = vmatmul.f32.gmra.mxu1 %v3534_v6  ;;  %v624_v5 = vpop.f32.mrf.mxu2 }
 0x11e   : > { %v2801_v16 = vadd.f32 %v624_v5, %v2630_v18  ;;  %v689_v23 = vpop.f32.mrf.mxu3 }
 0x11f   : > { %v2808_v58 = vadd.f32 %v689_v23, %v2634_v41  ;;  %v890_v23 = vld [vmem:[#allocation6 + $0x358] sm:$0xff] }
 0x120   : > { %v3535_v6 = vmax.f32 %v2801_v16, 0.0  ;;  %1382 = vmatpush.msrb.mxu3 %v890_v23  ;;  %v888_v23 = vld [vmem:[#allocation6 + $0x348] sm:$0xff] }
 0x121   : > { %v3536_v20 = vmax.f32 %v2808_v58, 0.0 }
 0x122   : > { %1081 = vmatmul.f32.gmra.mxu2 %v3535_v6  ;;  %1383 = vmatpush.msrb.mxu3 %v888_v23 }
 0x123   : > { %1146 = vmatmul.f32.gmra.mxu3 %v3536_v20 }
 0x124   : > { %978 = vmatmul.f32.gmra.mxu0 %v3538_v29  ;;  %1384 = vmatpush.msrb.mxu3 %v886_v30 }
 0x125   : > { %1043 = vmatmul.f32.gmra.mxu1 %v3539_v21  ;;  %v627_v42 = vpop.f32.mrf.mxu2 }
 0x126   : > { %v2823_v5 = vadd.f32 %v627_v42, %v2630_v18  ;;  %v692_v14 = vpop.f32.mrf.mxu3 }
 0x127   : > { %v2826_v6 = vadd.f32 %v692_v14, %v2634_v41 }
 0x128   : > { %v3540_v20 = vmax.f32 %v2823_v5, 0.0 }
 0x129   : > { %v3541_v1 = vmax.f32 %v2826_v6, 0.0  ;;  %v2830_v29 = vpop.f32.mrf.mxu0 }
 0x12a   : > { %1084 = vmatmul.f32.gmra.mxu2 %v3540_v20  ;;  %v2854_v38 = vpop.f32.mrf.mxu1 }
 0x12b   : > { %1149 = vmatmul.f32.gmra.mxu3 %v3541_v1 }
 0x12c   : > { %1193 = vmatmul.f32.vlgmr.msra.gmra.mxu0 %v719_v35 }
 0x12d   : > { %1258 = vmatmul.f32.vlgmr.msra.gmra.mxu1 %v720_v39  ;;  %v630_v42 = vpop.f32.mrf.mxu2  ;;  %v854_v39 = vld [vmem:[#allocation6 + $0x238] sm:$0xff] }
 0x12e   : > { %v2841_v14 = vadd.f32 %v630_v42, %v2630_v18  ;;  %v695_v21 = vpop.f32.mrf.mxu3  ;;  %1319 = vmatpush.msrb.mxu2 %v854_v39  ;;  %v884_v39 = vld [vmem:[#allocation6 + $0x328] sm:$0xff] }
 0x12f   : > { %v2844_v20 = vadd.f32 %v695_v21, %v2634_v41  ;;  %1385 = vmatpush.msrb.mxu3 %v884_v39  ;;  %v882_v39 = vld [vmem:[#allocation6 + $0x318] sm:$0xff] }
 0x130   : > { %v3542_v1 = vmax.f32 %v2841_v14, 0.0  ;;  %1320 = vmatpush.msrb.mxu2 %v852_v10  ;;  %v3572_v10 = vmax.f32 %v2524_v0, 0.0  ;;  %v3574_v0 = vmax.f32 %v2541_v24, 0.0 }
 0x131   : > { %v3543_v34 = vmax.f32 %v2844_v20, 0.0  ;;  %v2848_v35 = vpop.f32.mrf.mxu0  ;;  %1386 = vmatpush.msrb.mxu3 %v882_v39 }
 0x132   : > { %1087 = vmatmul.f32.gmra.mxu2 %v3542_v1 }
 0x133   : > { %1152 = vmatmul.f32.gmra.mxu3 %v3543_v34 }
 0x134   : > { %1196 = vmatmul.f32.gmra.mxu0 %v723_v47 }
 0x135   : > { %1261 = vmatmul.f32.gmra.mxu1 %v724_v48  ;;  %v633_v21 = vpop.f32.mrf.mxu2 }
 0x136   : > { %v2861_v42 = vadd.f32 %v633_v21, %v2630_v18  ;;  %v698_v23 = vpop.f32.mrf.mxu3  ;;  %v2878_v21 = vpop.f32.mrf.mxu1 }
 0x137   : > { %v2864_v1 = vadd.f32 %v698_v23, %v2634_v41 }
 0x138   : > { %v3544_v34 = vmax.f32 %v2861_v42, 0.0 }
 0x139   : > { %3568 = vst [vmem:[#allocation12_spill] sm:$0xff] %v2864_v1  ;;  %v3545_v45 = vmax.f32 %v2864_v1, 0.0  ;;  %v2868_v47 = vpop.f32.mrf.mxu0 }
 0x13a   : > { %1090 = vmatmul.f32.gmra.mxu2 %v3544_v34 }
 0x13b   : > { %1155 = vmatmul.f32.gmra.mxu3 %v3545_v45 }
 0x13c   : > { %1199 = vmatmul.f32.gmra.mxu0 %v727_v56 }
 0x13d   : > { %1264 = vmatmul.f32.gmra.mxu1 %v728_v57  ;;  %v636_v48 = vpop.f32.mrf.mxu2  ;;  %v850_v57 = vld [vmem:[#allocation6 + $0x218] sm:$0xff] }
 0x13e   : > { %v2881_v30 = vadd.f32 %v636_v48, %v2630_v18  ;;  %v701_v23 = vpop.f32.mrf.mxu3  ;;  %1321 = vmatpush.msrb.mxu2 %v850_v57  ;;  %v848_v57 = vld [vmem:[#allocation6 + $0x208] sm:$0xff] }
 0x13f   : > { %v2884_v34 = vadd.f32 %v701_v23, %v2634_v41 }
 0x140   : > { %3569 = vst [vmem:[#allocation13_spill] sm:$0xff] %v2881_v30  ;;  %v3547_v54 = vmax.f32 %v2881_v30, 0.0  ;;  %1322 = vmatpush.msrb.mxu2 %v848_v57 }
 0x141   : > { %3570 = vst [vmem:[#allocation14_spill] sm:$0xff] %v2884_v34  ;;  %v3549_v56 = vmax.f32 %v2884_v34, 0.0  ;;  %v2888_v45 = vpop.f32.mrf.mxu0  ;;  %v2904_v34 = vpop.f32.mrf.mxu1 }
 0x142   : > { %1093 = vmatmul.f32.gmra.mxu2 %v3547_v54 }
 0x143   : > { %1158 = vmatmul.f32.gmra.mxu3 %v3549_v56 }
 0x144   : > { %1202 = vmatmul.f32.gmra.mxu0 %v3571_v55 }
 0x145   : > { %1267 = vmatmul.f32.gmra.mxu1 %v3572_v10  ;;  %v639_v48 = vpop.f32.mrf.mxu2 }
 0x146   : > { %v2899_v23 = vadd.f32 %v639_v48, %v2630_v18  ;;  %v704_v1 = vpop.f32.mrf.mxu3  ;;  %v880_v48 = vld [vmem:[#allocation6 + $0x308] sm:$0xff] }
 0x147   : > { %v2902_v54 = vadd.f32 %v704_v1, %v2634_v41  ;;  %v3575_v1 = vmax.f32 %v2544_v11, 0.0  ;;  %1387 = vmatpush.msrb.mxu3 %v880_v48  ;;  %v3578_v11 = vmax.f32 %v2561_v19, 0.0 }
 0x148   : > { %v3551_v63 = vmax.f32 %v2899_v23, 0.0 }
 0x149   : > { %3573 = vst [vmem:[#allocation15_spill] sm:$0xff] %v2902_v54  ;;  %v3552_v55 = vmax.f32 %v2902_v54, 0.0  ;;  %v2908_v56 = vpop.f32.mrf.mxu0  ;;  %v2928_v54 = vpop.f32.mrf.mxu1 }
 0x14a   : > { %1096 = vmatmul.f32.gmra.mxu2 %v3551_v63 }
 0x14b   : > { %1161 = vmatmul.f32.gmra.mxu3 %v3552_v55 }
 0x14c   : > { %1205 = vmatmul.f32.gmra.mxu0 %v3574_v0 }
 0x14d   : > { %1270 = vmatmul.f32.gmra.mxu1 %v3575_v1  ;;  %v642_v10 = vpop.f32.mrf.mxu2 }
 0x14e   : > { %v2919_v39 = vadd.f32 %v642_v10, %v2630_v18  ;;  %v707_v30 = vpop.f32.mrf.mxu3 }
 0x14f   : > { %v2922_v63 = vadd.f32 %v707_v30, %v2634_v41  ;;  %v3579_v30 = vmax.f32 %v2564_v26, 0.0  ;;  %v3580_v26 = vmax.f32 %v2581_v28, 0.0 }
 0x150   : > { %3576 = vst [vmem:[#allocation16_spill] sm:$0xff] %v2919_v39  ;;  %v3555_v55 = vmax.f32 %v2919_v39, 0.0 }
 0x151   : > { %3577 = vst [vmem:[#allocation17_spill] sm:$0xff] %v2922_v63  ;;  %v3559_v24 = vmax.f32 %v2922_v63, 0.0  ;;  %v2926_v0 = vpop.f32.mrf.mxu0  ;;  %v2952_v19 = vpop.f32.mrf.mxu1 }
 0x152   : > { %1099 = vmatmul.f32.gmra.mxu2 %v3555_v55 }
 0x153   : > { %1164 = vmatmul.f32.gmra.mxu3 %v3559_v24 }
 0x154   : > { %1208 = vmatmul.f32.gmra.mxu0 %v3578_v11  ;;  %v1484_v11 = vld [vmem:[%s3495_s5 + $0x78] sm:$0xff] }
 0x155   : > { %1273 = vmatmul.f32.gmra.mxu1 %v3579_v30  ;;  %v645_v57 = vpop.f32.mrf.mxu2  ;;  %v3581_v30 = vmax.f32 %v2584_v46, 0.0  ;;  %1505 = vmatpush.msrb.mxu0 %v1484_v11  ;;  %v3583_v11 = vmax.f32 %v2601_v32, 0.0 }
 0x156   : > { %v2939_v1 = vadd.f32 %v645_v57, %v2630_v18  ;;  %v710_v10 = vpop.f32.mrf.mxu3 }
 0x157   : > { %v2942_v48 = vadd.f32 %v710_v10, %v2634_v41  ;;  %v1500_v10 = vld [vmem:[%s3495_s5 + $0xf8] sm:$0xff] }
 0x158   : > { %v3558_v39 = vmax.f32 %v2939_v1, 0.0  ;;  %1570 = vmatpush.msrb.mxu1 %v1500_v10  ;;  %v1499_v10 = vld [vmem:[%s3495_s5 + $0xf0] sm:$0xff] }
 0x159   : > { %v3557_v55 = vmax.f32 %v2942_v48, 0.0  ;;  %v2946_v63 = vpop.f32.mrf.mxu0 }
 0x15a   : > { %1102 = vmatmul.f32.gmra.mxu2 %v3558_v39  ;;  %1571 = vmatpush.msrb.mxu1 %v1499_v10 }
 0x15b   : > { %1167 = vmatmul.f32.gmra.mxu3 %v3557_v55 }
 0x15c   : > { %1211 = vmatmul.f32.gmra.mxu0 %v3580_v26 }
 0x15d   : > { %1276 = vmatmul.f32.gmra.mxu1 %v3581_v30  ;;  %v648_v57 = vpop.f32.mrf.mxu2  ;;  %v3584_v30 = vmax.f32 %v2604_v7, 0.0 }
 0x15e   : > { %v2965_v55 = vadd.f32 %v648_v57, %v2630_v18  ;;  %v713_v39 = vpop.f32.mrf.mxu3 }
 0x15f   : > { %v2968_v28 = vadd.f32 %v713_v39, %v2634_v41  ;;  %v1483_v39 = vld [vmem:[%s3495_s5 + $0x70] sm:$0xff] }
 0x160   : > { %v3560_v26 = vmax.f32 %v2965_v55, 0.0  ;;  %1506 = vmatpush.msrb.mxu0 %v1483_v39  ;;  %v3586_v39 = vmax.f32 %v2626_v36, 0.0  ;;  %v1481_v36 = vld [vmem:[%s3495_s5 + $0x60] sm:$0xff] }
 0x161   : > { %3582 = vst [vmem:[#allocation18_spill] sm:$0xff] %v2968_v28  ;;  %v3561_v24 = vmax.f32 %v2968_v28, 0.0  ;;  %v2972_v46 = vpop.f32.mrf.mxu0 }
 0x162   : > { %1105 = vmatmul.f32.gmra.mxu2 %v3560_v26  ;;  %v2988_v26 = vpop.f32.mrf.mxu1 }
 0x163   : > { %1170 = vmatmul.f32.gmra.mxu3 %v3561_v24 }
 0x164   : > { %1214 = vmatmul.f32.gmra.mxu0 %v3583_v11 }
 0x165   : > { %1279 = vmatmul.f32.gmra.mxu1 %v3584_v30  ;;  %v651_v57 = vpop.f32.mrf.mxu2 }
 0x166   : > { %v2991_v24 = vadd.f32 %v651_v57, %v2630_v18  ;;  %v716_v32 = vpop.f32.mrf.mxu3  ;;  %v3585_v18 = vmax.f32 %v2620_v37, 0.0  ;;  %v1498_v57 = vld [vmem:[%s3495_s5 + $0xe8] sm:$0xff]  ;;  %v3587_v37 = vmax.f32 %v2645_v17, 0.0  ;;  %v1497_v17 = vld [vmem:[%s3495_s5 + $0xe0] sm:$0xff] }
 0x167   : > { %v2994_v11 = vadd.f32 %v716_v32, %v2634_v41  ;;  %v1482_v41 = vld [vmem:[%s3495_s5 + $0x68] sm:$0xff]  ;;  %1572 = vmatpush.msrb.mxu1 %v1498_v57 }
 0x168   : > { %v3564_v28 = vmax.f32 %v2991_v24, 0.0  ;;  %1507 = vmatpush.msrb.mxu0 %v1482_v41  ;;  %v3589_v41 = vmax.f32 %v2642_v8, 0.0  ;;  %v1479_v8 = vld [vmem:[%s3495_s5 + $0x50] sm:$0xff] }
 0x169   : > { %v3563_v7 = vmax.f32 %v2994_v11, 0.0  ;;  %v2998_v30 = vpop.f32.mrf.mxu0  ;;  %1573 = vmatpush.msrb.mxu1 %v1497_v17  ;;  %v1477_v17 = vld [vmem:[%s3495_s5 + $0x40] sm:$0xff] }
 0x16a   : > { %1108 = vmatmul.f32.gmra.mxu2 %v3564_v28  ;;  %v3014_v10 = vpop.f32.mrf.mxu1  ;;  %1508 = vmatpush.msrb.mxu0 %v1481_v36  ;;  %v3591_v36 = vmax.f32 %v2671_v62, 0.0  ;;  %v1496_v62 = vld [vmem:[%s3495_s5 + $0xd8] sm:$0xff] }
 0x16b   : > { %1173 = vmatmul.f32.gmra.mxu3 %v3563_v7  ;;  %1574 = vmatpush.msrb.mxu1 %v1496_v62 }
 0x16c   : > { %1217 = vmatmul.f32.gmra.mxu0 %v3585_v18  ;;  %v3588_v18 = vmax.f32 %v2652_v33, 0.0  ;;  %v1480_v33 = vld [vmem:[%s3495_s5 + $0x58] sm:$0xff] }
 0x16d   : > { %1282 = vmatmul.f32.gmra.mxu1 %v3586_v39  ;;  %v3590_v39 = vmax.f32 %v2649_v27, 0.0  ;;  %1509 = vmatpush.msrb.mxu0 %v1480_v33  ;;  %v1478_v27 = vld [vmem:[%s3495_s5 + $0x48] sm:$0xff]  ;;  %v3593_v33 = vmax.f32 %v2668_v60, 0.0  ;;  %v1475_v60 = vld [vmem:[%s3495_s5 + $0x30] sm:$0xff] }
 0x16f   : > { %1510 = vmatpush.msrb.mxu0 %v1479_v8  ;;  %v3594_v8 = vmax.f32 %v2675_v43, 0.0  ;;  %v1474_v43 = vld [vmem:[%s3495_s5 + $0x28] sm:$0xff] }
 0x171   : > { %v3016_v32 = vpop.f32.mrf.mxu0  ;;  %1511 = vmatpush.msrb.mxu0 %v1478_v27 }
 0x172   : > { %1323 = vmatmul.f32.vlgmr.msrb.gmra.mxu2 %v3587_v37 }
 0x173   : > { %1388 = vmatmul.f32.vlgmr.msrb.gmra.mxu3 %v3588_v18  ;;  %v3045_v18 = vpop.f32.mrf.mxu1  ;;  %1512 = vmatpush.msrb.mxu0 %v1477_v17  ;;  %v1473_v17 = vld [vmem:[%s3495_s5 + $0x20] sm:$0xff] }
 0x174   : > { %1220 = vmatmul.f32.gmra.mxu0 %v3589_v41 }
 0x175   : > { %1285 = vmatmul.f32.gmra.mxu1 %v3590_v39  ;;  %v3029_v57 = vpop.f32.mrf.mxu2  ;;  %v3592_v39 = vmax.f32 %v2678_v52, 0.0  ;;  %v1476_v52 = vld [vmem:[%s3495_s5 + $0x38] sm:$0xff] }
 0x176   : > { %v3037_v37 = vpop.f32.mrf.mxu3  ;;  %1513 = vmatpush.msrb.mxu0 %v1476_v52  ;;  %v3598_v52 = vmax.f32 %v2701_v44, 0.0  ;;  %v1470_v44 = vld [vmem:[%s3495_s5 + $0x8] sm:$0xff] }
 0x178   : > { %1514 = vmatpush.msrb.mxu0 %v1475_v60  ;;  %v1472_v60 = vld [vmem:[%s3495_s5 + $0x18] sm:$0xff] }
 0x179   : > { %v3049_v41 = vpop.f32.mrf.mxu0 }
 0x17a   : > { %1326 = vmatmul.f32.gmra.mxu2 %v3591_v36  ;;  %v3595_v36 = vmax.f32 %v2697_v53, 0.0  ;;  %1515 = vmatpush.msrb.mxu0 %v1474_v43 }
 0x17b   : > { %1391 = vmatmul.f32.gmra.mxu3 %v3592_v39  ;;  %v3596_v39 = vmax.f32 %v2704_v49, 0.0  ;;  %v1495_v49 = vld [vmem:[%s3495_s5 + $0xd0] sm:$0xff] }
 0x17c   : > { %1223 = vmatmul.f32.gmra.mxu0 %v3593_v33  ;;  %v3083_v33 = vpop.f32.mrf.mxu1  ;;  %1575 = vmatpush.msrb.mxu1 %v1495_v49  ;;  %v3602_v49 = vmax.f32 %v2727_v22, 0.0  ;;  %v1493_v22 = vld [vmem:[%s3495_s5 + $0xc0] sm:$0xff] }
 0x17d   : > { %1288 = vmatmul.f32.gmra.mxu1 %v3594_v8  ;;  %v3060_v7 = vpop.f32.mrf.mxu2  ;;  %v3597_v8 = vmax.f32 %v2694_v59, 0.0  ;;  %1516 = vmatpush.msrb.mxu0 %v1473_v17  ;;  %v1471_v59 = vld [vmem:[%s3495_s5 + $0x10] sm:$0xff]  ;;  %v1469_v17 = vld [vmem:[%s3495_s5] sm:$0xff] }
 0x17e   : > { %v3068_v27 = vpop.f32.mrf.mxu3 }
 0x17f   : > { %1517 = vmatpush.msrb.mxu0 %v1472_v60 }
 0x181   : > { %v3087_v62 = vpop.f32.mrf.mxu0  ;;  %1518 = vmatpush.msrb.mxu0 %v1471_v59 }
 0x182   : > { %1329 = vmatmul.f32.gmra.mxu2 %v3595_v36  ;;  %v3599_v36 = vmax.f32 %v2723_v15, 0.0 }
 0x183   : > { %1394 = vmatmul.f32.gmra.mxu3 %v3596_v39  ;;  %v3600_v39 = vmax.f32 %v2730_v51, 0.0  ;;  %1519 = vmatpush.msrb.mxu0 %v1470_v44  ;;  %v3604_v44 = vmax.f32 %v2756_v13, 0.0 }
 0x184   : > { %1226 = vmatmul.f32.gmra.mxu0 %v3597_v8  ;;  %v3601_v8 = vmax.f32 %v2720_v4, 0.0  ;;  %v3123_v51 = vpop.f32.mrf.mxu1  ;;  %v3603_v4 = vmax.f32 %v2749_v3, 0.0 }
 0x185   : > { %1291 = vmatmul.f32.gmra.mxu1 %v3598_v52  ;;  %v3091_v53 = vpop.f32.mrf.mxu2  ;;  %v1494_v52 = vld [vmem:[%s3495_s5 + $0xc8] sm:$0xff]  ;;  %1520 = vmatpush.msrb.mxu0 %v1469_v17  ;;  %v3606_v17 = vmax.f32 %v2753_v25, 0.0  ;;  %v3608_v25 = vmax.f32 %v2782_v9, 0.0 }
 0x186   : > { %v3099_v43 = vpop.f32.mrf.mxu3  ;;  %1576 = vmatpush.msrb.mxu1 %v1494_v52 }
 0x188   : > { %1577 = vmatpush.msrb.mxu1 %v1493_v22  ;;  %v3610_v22 = vmax.f32 %v2779_v31, 0.0  ;;  %v3612_v31 = vmax.f32 %v2808_v58, 0.0 }
 0x189   : > { %v3127_v59 = vpop.f32.mrf.mxu0 }
 0x18a   : > { %1332 = vmatmul.f32.gmra.mxu2 %v3599_v36  ;;  %v3605_v36 = vmax.f32 %v2746_v12, 0.0 }
 0x18b   : > { %1397 = vmatmul.f32.gmra.mxu3 %v3600_v39  ;;  %v3141_v39 = vld [vmem:[%s3494_s4] sm:$0x3] }
 0x18c   : > { %1229 = vmatmul.f32.gmra.mxu0 %v3601_v8  ;;  %v3150_v12 = vperm.slane %v3141_v39, 0  ;;  %v3152_v13 = vpop.f32.mrf.mxu1 }
 0x18d   : > { %1294 = vmatmul.f32.gmra.mxu1 %v3602_v49  ;;  %v3121_v15 = vpop.f32.mrf.mxu2 }
 0x18e   : > { %v3125_v60 = vpop.f32.mrf.mxu3  ;;  %v935_v49 = vadd.f32 %v2830_v29, %v3150_v12  ;;  %v938_v9 = vadd.f32 %v2848_v35, %v3150_v12  ;;  %v3614_v35 = vmax.f32 %v2805_v2, 0.0  ;;  %v3616_v2 = vmax.f32 %v2826_v6, 0.0 }
 0x18f   : > { %v944_v6 = vadd.f32 %v2888_v45, %v3150_v12 }
 0x190   : > { %v1000_v29 = vadd.f32 %v2854_v38, %v935_v49  ;;  %v3613_v38 = vmax.f32 %v2798_v40, 0.0  ;;  %v1491_v49 = vld [vmem:[%s3495_s5 + $0xb0] sm:$0xff]  ;;  %v941_v40 = vadd.f32 %v2868_v47, %v3150_v12 }
 0x191   : > { %v3154_v52 = vpop.f32.mrf.mxu0 }
 0x192   : > { %1335 = vmatmul.f32.gmra.mxu2 %v3603_v4  ;;  %v3607_v4 = vmax.f32 %v2775_v50, 0.0  ;;  %v1006_v47 = vadd.f32 %v2904_v34, %v941_v40  ;;  %v1489_v34 = vld [vmem:[%s3495_s5 + $0xa0] sm:$0xff] }
 0x193   : > { %1400 = vmatmul.f32.gmra.mxu3 %v3604_v44  ;;  %v3609_v44 = vmax.f32 %v2772_v61, 0.0  ;;  %v1065_v61 = vadd.f32 %v3029_v57, %v1000_v29  ;;  %v3615_v29 = vmax.f32 %v2823_v5, 0.0 }
 0x194   : > { %1232 = vmatmul.f32.gmra.mxu0 %v3605_v36  ;;  %v1492_v36 = vld [vmem:[%s3495_s5 + $0xb8] sm:$0xff]  ;;  %v3177_v50 = vpop.f32.mrf.mxu1 }
 0x195   : > { %1297 = vmatmul.f32.gmra.mxu1 %v3606_v17  ;;  %v3145_v3 = vpop.f32.mrf.mxu2 }
 0x196   : > { %v3147_v8 = vpop.f32.mrf.mxu3  ;;  %1578 = vmatpush.msrb.mxu1 %v1492_v36 }
 0x198   : > { %1579 = vmatpush.msrb.mxu1 %v1491_v49  ;;  %v3618_v49 = vmax.f32 %v2844_v20, 0.0  ;;  %v947_v20 = vadd.f32 %v2908_v56, %v3150_v12 }
 0x19a   : > { %1338 = vmatmul.f32.gmra.mxu2 %v3607_v4  ;;  %v3611_v4 = vmax.f32 %v2801_v16, 0.0  ;;  %v1003_v16 = vadd.f32 %v2878_v21, %v938_v9  ;;  %v1490_v21 = vld [vmem:[%s3495_s5 + $0xa8] sm:$0xff] }
 0x19b   : > { %1403 = vmatmul.f32.gmra.mxu3 %v3608_v25  ;;  %v3181_v25 = vpop.f32.mrf.mxu0  ;;  %1580 = vmatpush.msrb.mxu1 %v1490_v21 }
 0x19c   : > { %1235 = vmatmul.f32.gmra.mxu0 %v3609_v44  ;;  %v1130_v44 = vadd.f32 %v3037_v37, %v1065_v61 }
 0x19d   : > { %1300 = vmatmul.f32.gmra.mxu1 %v3610_v22  ;;  %v3169_v17 = vpop.f32.mrf.mxu2  ;;  %v1068_v22 = vadd.f32 %v3060_v7, %v1003_v16 }
 0x19e   : > { %v3172_v28 = vpop.f32.mrf.mxu3  ;;  %v1437_v58 = vmax.f32 %v1130_v44, 0.0  ;;  %1581 = vmatpush.msrb.mxu1 %v1489_v34 }
 0x19f   : > { %v1133_v5 = vadd.f32 %v3068_v27, %v1068_v22  ;;  %v3620_v22 = vld [vmem:[#allocation12_spill] sm:$0xff] }
 0x1a1   : > { %v1439_v61 = vmax.f32 %v1133_v5, 0.0 }
 0x1a2   : > { %1341 = vmatmul.f32.gmra.mxu2 %v3611_v4  ;;  %v3205_v4 = vpop.f32.mrf.mxu1 }
 0x1a3   : > { %1406 = vmatmul.f32.gmra.mxu3 %v3612_v31  ;;  %v3210_v37 = vpop.f32.mrf.mxu0  ;;  %v1071_v31 = vadd.f32 %v3091_v53, %v1006_v47  ;;  %v950_v47 = vadd.f32 %v2926_v0, %v3150_v12 }
 0x1a4   : > { %1238 = vmatmul.f32.gmra.mxu0 %v3613_v38  ;;  %v3617_v38 = vmax.f32 %v2841_v14, 0.0 }
 0x1a5   : > { %1303 = vmatmul.f32.gmra.mxu1 %v3614_v35  ;;  %v3192_v57 = vpop.f32.mrf.mxu2  ;;  %v1009_v35 = vadd.f32 %v2928_v54, %v944_v6  ;;  %v1136_v45 = vadd.f32 %v3099_v43, %v1071_v31  ;;  %v1488_v54 = vld [vmem:[%s3495_s5 + $0x98] sm:$0xff]  ;;  %v1015_v34 = vadd.f32 %v2988_v26, %v950_v47  ;;  %v1486_v26 = vld [vmem:[%s3495_s5 + $0x88] sm:$0xff] }
 0x1a6   : > { %v3196_v36 = vpop.f32.mrf.mxu3  ;;  %1582 = vmatpush.msrb.mxu1 %v1488_v54  ;;  %v3629_v47 = vld [vmem:[#allocation16_spill] sm:$0xff] }
 0x1a7   : > { %v1441_v44 = vmax.f32 %v1136_v45, 0.0  ;;  %v1074_v40 = vadd.f32 %v3121_v15, %v1009_v35 }
 0x1a9   : > { %v1139_v56 = vadd.f32 %v3125_v60, %v1074_v40  ;;  %v3626_v40 = vmax.f32 %v2899_v23, 0.0  ;;  %v956_v23 = vadd.f32 %v2972_v46, %v3150_v12 }
 0x1aa   : > { %1344 = vmatmul.f32.gmra.mxu2 %v3615_v29  ;;  %v3232_v16 = vpop.f32.mrf.mxu1  ;;  %v3621_v29 = vmax.f32 %v3620_v22, 0.0  ;;  %v3627_v22 = vld [vmem:[#allocation15_spill] sm:$0xff] }
 0x1ab   : > { %1409 = vmatmul.f32.gmra.mxu3 %v3616_v2  ;;  %v3236_v14 = vpop.f32.mrf.mxu0  ;;  %v1012_v2 = vadd.f32 %v2952_v19, %v947_v20  ;;  %v1443_v5 = vmax.f32 %v1139_v56, 0.0  ;;  %v1487_v19 = vld [vmem:[%s3495_s5 + $0x90] sm:$0xff]  ;;  %v1080_v20 = vadd.f32 %v3169_v17, %v1015_v34  ;;  %v1021_v46 = vadd.f32 %v3045_v18, %v956_v23 }
 0x1ac   : > { %1521 = vmatmul.f32.vlgmr.msrb.gmra.mxu0 %v1437_v58  ;;  %v3619_v58 = vmax.f32 %v2861_v42, 0.0  ;;  %1583 = vmatpush.msrb.mxu1 %v1487_v19 }
 0x1ad   : > { %v3212_v9 = vpop.f32.mrf.mxu2  ;;  %v1077_v6 = vadd.f32 %v3145_v3, %v1012_v2  ;;  %v953_v3 = vadd.f32 %v2946_v63, %v3150_v12  ;;  %v1145_v17 = vadd.f32 %v3172_v28, %v1080_v20  ;;  %v1485_v28 = vld [vmem:[%s3495_s5 + $0x80] sm:$0xff] }
 0x1ae   : > { %v3216_v7 = vpop.f32.mrf.mxu3  ;;  %1584 = vmatpush.msrb.mxu1 %v1486_v26  ;;  %v1086_v34 = vadd.f32 %v3212_v9, %v1021_v46  ;;  %v3636_v26 = vld [vmem:[#allocation18_spill] sm:$0xff] }
 0x1af   : > { %v1142_v0 = vadd.f32 %v3147_v8, %v1077_v6  ;;  %v1018_v63 = vadd.f32 %v3014_v10, %v953_v3  ;;  %v1447_v2 = vmax.f32 %v1145_v17, 0.0  ;;  %v3631_v6 = vld [vmem:[#allocation17_spill] sm:$0xff]  ;;  %v3634_v3 = vmax.f32 %v2942_v48, 0.0 }
 0x1b0   : > { %1585 = vmatpush.msrb.mxu1 %v1485_v28  ;;  %v1151_v18 = vadd.f32 %v3216_v7, %v1086_v34  ;;  %v3635_v48 = vmax.f32 %v2965_v55, 0.0 }
 0x1b1   : > { %v1445_v45 = vmax.f32 %v1142_v0, 0.0  ;;  %v1083_v56 = vadd.f32 %v3192_v57, %v1018_v63  ;;  %v3633_v0 = vmax.f32 %v2939_v1, 0.0  ;;  %v962_v63 = vadd.f32 %v3016_v32, %v3150_v12 }
 0x1b2   : > { %1347 = vmatmul.f32.gmra.mxu2 %v3617_v38  ;;  %v3254_v15 = vpop.f32.mrf.mxu1  ;;  %v3624_v38 = vld [vmem:[#allocation14_spill] sm:$0xff]  ;;  %v1451_v1 = vmax.f32 %v1151_v18, 0.0  ;;  %v3639_v32 = vmax.f32 %v2994_v11, 0.0 }
 0x1b3   : > { %1412 = vmatmul.f32.gmra.mxu3 %v3618_v49  ;;  %v3256_v42 = vpop.f32.mrf.mxu0  ;;  %v3625_v49 = vmax.f32 %v3624_v38, 0.0  ;;  %v1148_v57 = vadd.f32 %v3196_v36, %v1083_v56 }
 0x1b4   : > { %1524 = vmatmul.f32.gmra.mxu0 %v1439_v61  ;;  %v3622_v61 = vld [vmem:[#allocation13_spill] sm:$0xff] }
 0x1b5   : > { %v3228_v27 = vpop.f32.mrf.mxu2  ;;  %v3623_v31 = vmax.f32 %v3622_v61, 0.0  ;;  %v3632_v61 = vmax.f32 %v3631_v6, 0.0  ;;  %v1449_v19 = vmax.f32 %v1148_v57, 0.0 }
 0x1b6   : > { %v3234_v53 = vpop.f32.mrf.mxu3 }
 0x1ba   : > { %1350 = vmatmul.f32.gmra.mxu2 %v3619_v58 }
 0x1bb   : > { %1415 = vmatmul.f32.gmra.mxu3 %v3621_v29  ;;  %v3281_v58 = vpop.f32.mrf.mxu0  ;;  %v3628_v29 = vmax.f32 %v3627_v22, 0.0 }
 0x1bc   : > { %1527 = vmatmul.f32.gmra.mxu0 %v1441_v44  ;;  %v3277_v44 = vpop.f32.mrf.mxu1 }
 0x1bd   : > { %v3248_v43 = vpop.f32.mrf.mxu2 }
 0x1be   : > { %v3252_v21 = vpop.f32.mrf.mxu3 }
 0x1c2   : > { %1353 = vmatmul.f32.gmra.mxu2 %v3623_v31 }
 0x1c3   : > { %1418 = vmatmul.f32.gmra.mxu3 %v3625_v49  ;;  %v3304_v10 = vpop.f32.mrf.mxu0 }
 0x1c4   : > { %1530 = vmatmul.f32.gmra.mxu0 %v1443_v5  ;;  %v3630_v5 = vmax.f32 %v3629_v47, 0.0  ;;  %v1259_v31 = vpop.f32.mrf.mxu1  ;;  %v3638_v47 = vmax.f32 %v2991_v24, 0.0 }
 0x1c5   : > { %v3268_v60 = vpop.f32.mrf.mxu2 }
 0x1c6   : > { %v3272_v35 = vpop.f32.mrf.mxu3 }
 0x1ca   : > { %1356 = vmatmul.f32.gmra.mxu2 %v3626_v40 }
 0x1cb   : > { %1421 = vmatmul.f32.gmra.mxu3 %v3628_v29  ;;  %v3324_v22 = vpop.f32.mrf.mxu0 }
 0x1cc   : > { %1533 = vmatmul.f32.gmra.mxu0 %v1445_v45  ;;  %v959_v45 = vadd.f32 %v2998_v30, %v3150_v12  ;;  %v1262_v36 = vpop.f32.mrf.mxu1  ;;  %v3637_v30 = vmax.f32 %v3636_v26, 0.0 }
 0x1cd   : > { %v3288_v8 = vpop.f32.mrf.mxu2 }
 0x1ce   : > { %v3292_v54 = vpop.f32.mrf.mxu3  ;;  %v1024_v9 = vadd.f32 %v3083_v33, %v959_v45  ;;  %v1027_v33 = vadd.f32 %v3123_v51, %v962_v63  ;;  %v974_v63 = vadd.f32 %v3154_v52, %v3150_v12 }
 0x1d0   : > { %v1089_v29 = vadd.f32 %v3228_v27, %v1024_v9  ;;  %v1092_v56 = vadd.f32 %v3248_v43, %v1027_v33 }
 0x1d2   : > { %1359 = vmatmul.f32.gmra.mxu2 %v3630_v5  ;;  %v1154_v17 = vadd.f32 %v3234_v53, %v1089_v29  ;;  %v965_v5 = vadd.f32 %v3049_v41, %v3150_v12  ;;  %v3350_v53 = vperm.slane %v3141_v39, 1  ;;  %v1157_v6 = vadd.f32 %v3252_v21, %v1092_v56 }
 0x1d3   : > { %1424 = vmatmul.f32.gmra.mxu3 %v3632_v61  ;;  %v3340_v27 = vpop.f32.mrf.mxu0  ;;  %v968_v39 = vadd.f32 %v3087_v62, %v3150_v12  ;;  %v971_v62 = vadd.f32 %v3127_v59, %v3150_v12 }
 0x1d4   : > { %1536 = vmatmul.f32.gmra.mxu0 %v1447_v2  ;;  %v1265_v2 = vpop.f32.mrf.mxu1  ;;  %v1453_v55 = vmax.f32 %v1154_v17, 0.0  ;;  %v1030_v43 = vadd.f32 %v3152_v13, %v965_v5  ;;  %v1195_v24 = vadd.f32 %v3236_v14, %v3350_v53  ;;  %v1455_v11 = vmax.f32 %v1157_v6, 0.0 }
 0x1d5   : > { %v3306_v38 = vpop.f32.mrf.mxu2  ;;  %v1033_v13 = vadd.f32 %v3177_v50, %v968_v39  ;;  %v1198_v14 = vadd.f32 %v3256_v42, %v3350_v53  ;;  %v1036_v42 = vadd.f32 %v3205_v4, %v971_v62  ;;  %v977_v6 = vadd.f32 %v3181_v25, %v3150_v12 }
 0x1d6   : > { %v3310_v49 = vpop.f32.mrf.mxu3  ;;  %v1095_v46 = vadd.f32 %v3268_v60, %v1030_v43  ;;  %v1260_v57 = vadd.f32 %v1259_v31, %v1195_v24 }
 0x1d7   : > { %v1098_v60 = vadd.f32 %v3288_v8, %v1033_v13  ;;  %v1263_v31 = vadd.f32 %v1262_v36, %v1198_v14  ;;  %v1201_v8 = vadd.f32 %v3281_v58, %v3350_v53  ;;  %v1101_v59 = vadd.f32 %v3306_v38, %v1036_v42 }
 0x1d8   : > { %v1160_v21 = vadd.f32 %v3272_v35, %v1095_v46  ;;  %v1039_v58 = vadd.f32 %v3232_v16, %v974_v63  ;;  %v1204_v38 = vadd.f32 %v3304_v10, %v3350_v53  ;;  %v1042_v16 = vadd.f32 %v3254_v15, %v977_v6 }
 0x1d9   : > { %v1163_v50 = vadd.f32 %v3292_v54, %v1098_v60  ;;  %v1266_v17 = vadd.f32 %v1265_v2, %v1201_v8  ;;  %v1207_v10 = vadd.f32 %v3324_v22, %v3350_v53  ;;  %v1210_v14 = vadd.f32 %v3340_v27, %v3350_v53 }
 0x1da   : > { %1362 = vmatmul.f32.gmra.mxu2 %v3633_v0  ;;  %v1457_v45 = vmax.f32 %v1160_v21, 0.0 }
 0x1db   : > { %1427 = vmatmul.f32.gmra.mxu3 %v3634_v3  ;;  %v3361_v41 = vpop.f32.mrf.mxu0 }
 0x1dc   : > { %1539 = vmatmul.f32.gmra.mxu0 %v1449_v19  ;;  %v1268_v28 = vpop.f32.mrf.mxu1 }
 0x1dd   : > { %v3319_v20 = vpop.f32.mrf.mxu2  ;;  %v1269_v43 = vadd.f32 %v1268_v28, %v1204_v38  ;;  %v980_v28 = vadd.f32 %v3210_v37, %v3150_v12 }
 0x1de   : > { %v3322_v40 = vpop.f32.mrf.mxu3  ;;  %v1104_v52 = vadd.f32 %v3319_v20, %v1039_v58 }
 0x1df   : > { %v1045_v22 = vadd.f32 %v3277_v44, %v980_v28  ;;  %v1213_v44 = vadd.f32 %v3361_v41, %v3350_v53 }
 0x1e0   : > { %v1169_v24 = vadd.f32 %v3322_v40, %v1104_v52 }
 0x1e2   : > { %1365 = vmatmul.f32.gmra.mxu2 %v3635_v48 }
 0x1e3   : > { %1430 = vmatmul.f32.gmra.mxu3 %v3637_v30  ;;  %v3372_v35 = vpop.f32.mrf.mxu0  ;;  %v1459_v30 = vmax.f32 %v1163_v50, 0.0 }
 0x1e4   : > { %1542 = vmatmul.f32.gmra.mxu0 %v1451_v1  ;;  %v1271_v9 = vpop.f32.mrf.mxu1 }
 0x1e5   : > { %v3334_v7 = vpop.f32.mrf.mxu2 }
 0x1e6   : > { %v3337_v23 = vpop.f32.mrf.mxu3  ;;  %v1107_v21 = vadd.f32 %v3334_v7, %v1042_v16 }
 0x1ea   : > { %1368 = vmatmul.f32.gmra.mxu2 %v3638_v47 }
 0x1eb   : > { %1433 = vmatmul.f32.gmra.mxu3 %v3639_v32  ;;  %v3382_v47 = vpop.f32.mrf.mxu0 }
 0x1ec   : > { %1545 = vmatmul.f32.gmra.mxu0 %v1453_v55  ;;  %v1274_v54 = vpop.f32.mrf.mxu1  ;;  %v1166_v55 = vadd.f32 %v3310_v49, %v1101_v59 }
 0x1ed   : > { %v3352_v51 = vpop.f32.mrf.mxu2  ;;  %v1275_v37 = vadd.f32 %v1274_v54, %v1210_v14 }
 0x1ee   : > { %v3355_v61 = vpop.f32.mrf.mxu3  ;;  %v1461_v5 = vmax.f32 %v1166_v55, 0.0  ;;  %v1110_v60 = vadd.f32 %v3352_v51, %v1045_v22  ;;  %v1219_v55 = vadd.f32 %v3382_v47, %v3350_v53 }
 0x1f3   : > { %v1221_v20 = vpop.f32.mrf.mxu0 }
 0x1f4   : > { %1548 = vmatmul.f32.gmra.mxu0 %v1455_v11  ;;  %v1277_v39 = vpop.f32.mrf.mxu1 }
 0x1f5   : > { %v1324_v19 = vpop.f32.mrf.mxu2 }
 0x1f6   : > { %v1325_v34 = vadd.f32 %v1324_v19, %v1260_v57  ;;  %v1389_v0 = vpop.f32.mrf.mxu3  ;;  %v1463_v19 = vmax.f32 %v1169_v24, 0.0 }
 0x1f8   : > { %v1390_v3 = vadd.f32 %v1389_v0, %v1325_v34  ;;  %v1272_v34 = vadd.f32 %v1271_v9, %v1207_v10  ;;  %v1172_v0 = vadd.f32 %v3337_v23, %v1107_v21  ;;  %v1175_v23 = vadd.f32 %v3355_v61, %v1110_v60 }
 0x1fa   : > { %v1438_v18 = vmax.f32 %v1390_v3, 0.0  ;;  %v1465_v7 = vmax.f32 %v1172_v0, 0.0  ;;  %v1467_v27 = vmax.f32 %v1175_v23, 0.0 }
 0x1fb   : > { %v1224_v12 = vpop.f32.mrf.mxu0 }
 0x1fc   : > { %1551 = vmatmul.f32.gmra.mxu0 %v1457_v45  ;;  %1586 = vmatmul.f32.vlgmr.msrb.gmra.mxu1 %v1438_v18  ;;  %v1280_v45 = vpop.f32.mrf.mxu1  ;;  %v1225_v47 = vadd.f32 %v1224_v12, %v3350_v53 }
 0x1fd   : > { %v1327_v1 = vpop.f32.mrf.mxu2 }
 0x1fe   : > { %v1328_v29 = vadd.f32 %v1327_v1, %v1263_v31  ;;  %v1392_v48 = vpop.f32.mrf.mxu3 }
 0x200   : > { %v1393_v26 = vadd.f32 %v1392_v48, %v1328_v29  ;;  %v1278_v29 = vadd.f32 %v1277_v39, %v1213_v44 }
 0x202   : > { %v1440_v36 = vmax.f32 %v1393_v26, 0.0 }
 0x203   : > { %v1227_v51 = vpop.f32.mrf.mxu0 }
 0x204   : > { %1554 = vmatmul.f32.gmra.mxu0 %v1459_v30  ;;  %1589 = vmatmul.f32.gmra.mxu1 %v1440_v36  ;;  %v1283_v48 = vpop.f32.mrf.mxu1  ;;  %v1216_v30 = vadd.f32 %v3372_v35, %v3350_v53  ;;  %v1222_v35 = vadd.f32 %v1221_v20, %v3350_v53  ;;  %v1228_v28 = vadd.f32 %v1227_v51, %v3350_v53 }
 0x205   : > { %v1330_v33 = vpop.f32.mrf.mxu2  ;;  %v1284_v58 = vadd.f32 %v1283_v48, %v1219_v55 }
 0x206   : > { %v1331_v56 = vadd.f32 %v1330_v33, %v1266_v17  ;;  %v1395_v4 = vpop.f32.mrf.mxu3  ;;  %v1281_v36 = vadd.f32 %v1280_v45, %v1216_v30 }
 0x208   : > { %v1396_v32 = vadd.f32 %v1395_v4, %v1331_v56 }
 0x20a   : > { %v1442_v2 = vmax.f32 %v1396_v32, 0.0 }
 0x20b   : > { %v1230_v54 = vpop.f32.mrf.mxu0 }
 0x20c   : > { %1557 = vmatmul.f32.gmra.mxu0 %v1461_v5  ;;  %1592 = vmatmul.f32.gmra.mxu1 %v1442_v2  ;;  %v1286_v41 = vpop.f32.mrf.mxu1  ;;  %v1231_v45 = vadd.f32 %v1230_v54, %v3350_v53 }
 0x20d   : > { %v1333_v49 = vpop.f32.mrf.mxu2 }
 0x20e   : > { %v1334_v11 = vadd.f32 %v1333_v49, %v1269_v43  ;;  %v1398_v46 = vpop.f32.mrf.mxu3  ;;  %v1287_v49 = vadd.f32 %v1286_v41, %v1222_v35  ;;  %v3419_v35 = vld [vmem:[%s3496_s6] ss:$0 sm:$0xff] }
 0x210   : > { %v1399_v57 = vadd.f32 %v1398_v46, %v1334_v11 }
 0x212   : > { %v1444_v25 = vmax.f32 %v1399_v57, 0.0 }
 0x213   : > { %v1233_v6 = vpop.f32.mrf.mxu0 }
 0x214   : > { %1560 = vmatmul.f32.gmra.mxu0 %v1463_v19  ;;  %1595 = vmatmul.f32.gmra.mxu1 %v1444_v25  ;;  %v1289_v52 = vpop.f32.mrf.mxu1 }
 0x215   : > { %v1336_v40 = vpop.f32.mrf.mxu2  ;;  %v1290_v19 = vadd.f32 %v1289_v52, %v1225_v47 }
 0x216   : > { %v1337_v15 = vadd.f32 %v1336_v40, %v1272_v34  ;;  %v1401_v13 = vpop.f32.mrf.mxu3 }
 0x218   : > { %v1402_v3 = vadd.f32 %v1401_v13, %v1337_v15 }
 0x21a   : > { %v1446_v18 = vmax.f32 %v1402_v3, 0.0 }
 0x21b   : > { %v1236_v57 = vpop.f32.mrf.mxu0 }
 0x21c   : > { %1563 = vmatmul.f32.gmra.mxu0 %v1465_v7  ;;  %1598 = vmatmul.f32.gmra.mxu1 %v1446_v18  ;;  %v1292_v10 = vpop.f32.mrf.mxu1  ;;  %v1237_v51 = vadd.f32 %v1236_v57, %v3350_v53 }
 0x21d   : > { %v1339_v62 = vpop.f32.mrf.mxu2  ;;  %v1293_v0 = vadd.f32 %v1292_v10, %v1228_v28 }
 0x21e   : > { %v1340_v31 = vadd.f32 %v1339_v62, %v1275_v37  ;;  %v1404_v9 = vpop.f32.mrf.mxu3 }
 0x220   : > { %v1405_v1 = vadd.f32 %v1404_v9, %v1340_v31  ;;  %v1234_v9 = vadd.f32 %v1233_v6, %v3350_v53 }
 0x222   : > { %v1448_v50 = vmax.f32 %v1405_v1, 0.0 }
 0x223   : > { %v1239_v13 = vpop.f32.mrf.mxu0 }
 0x224   : > { %1566 = vmatmul.f32.gmra.mxu0 %v1467_v27  ;;  %1601 = vmatmul.f32.gmra.mxu1 %v1448_v50  ;;  %v1295_v15 = vpop.f32.mrf.mxu1  ;;  %v1240_v41 = vadd.f32 %v1239_v13, %v3350_v53 }
 0x225   : > { %v1342_v42 = vpop.f32.mrf.mxu2  ;;  %v1296_v18 = vadd.f32 %v1295_v15, %v1231_v45 }
 0x226   : > { %v1343_v8 = vadd.f32 %v1342_v42, %v1278_v29  ;;  %v1407_v26 = vpop.f32.mrf.mxu3 }
 0x228   : > { %v1408_v61 = vadd.f32 %v1407_v26, %v1343_v8 }
 0x22a   : > { %v1450_v59 = vmax.f32 %v1408_v61, 0.0 }
 0x22b   : > { %v1522_v31 = vpop.f32.mrf.mxu0 }
 0x22c   : > { %1604 = vmatmul.f32.gmra.mxu1 %v1450_v59  ;;  %v1298_v23 = vpop.f32.mrf.mxu1  ;;  %v1523_v53 = vadd.f32 %v3419_v35, %v1522_v31 }
 0x22d   : > { %v1345_v63 = vpop.f32.mrf.mxu2  ;;  %v1299_v27 = vadd.f32 %v1298_v23, %v1234_v9 }
 0x22e   : > { %v1346_v17 = vadd.f32 %v1345_v63, %v1281_v36  ;;  %v1410_v33 = vpop.f32.mrf.mxu3 }
 0x230   : > { %v1411_v56 = vadd.f32 %v1410_v33, %v1346_v17 }
 0x232   : > { %v1452_v4 = vmax.f32 %v1411_v56, 0.0 }
 0x233   : > { %v1525_v26 = vpop.f32.mrf.mxu0 }
 0x234   : > { %1607 = vmatmul.f32.gmra.mxu1 %v1452_v4  ;;  %v1301_v8 = vpop.f32.mrf.mxu1 }
 0x235   : > { %v1348_v38 = vpop.f32.mrf.mxu2  ;;  %v1302_v61 = vadd.f32 %v1301_v8, %v1237_v51 }
 0x236   : > { %v1349_v32 = vadd.f32 %v1348_v38, %v1284_v58  ;;  %v1413_v5 = vpop.f32.mrf.mxu3 }
 0x238   : > { %v1414_v2 = vadd.f32 %v1413_v5, %v1349_v32 }
 0x23a   : > { %v1454_v43 = vmax.f32 %v1414_v2, 0.0 }
 0x23b   : > { %v1528_v55 = vpop.f32.mrf.mxu0 }
 0x23c   : > { %1610 = vmatmul.f32.gmra.mxu1 %v1454_v43  ;;  %v1304_v54 = vpop.f32.mrf.mxu1  ;;  %v3425_v43 = vld [vmem:[%s3497_s7] ss:$0 sm:$0xff]  ;;  %v1529_v57 = vadd.f32 %v3419_v35, %v1528_v55 }
 0x23d   : > { %v1351_v24 = vpop.f32.mrf.mxu2  ;;  %v1305_v56 = vadd.f32 %v1304_v54, %v1240_v41 }
 0x23e   : > { %v1352_v11 = vadd.f32 %v1351_v24, %v1287_v49  ;;  %v1416_v46 = vpop.f32.mrf.mxu3 }
 0x240   : > { %v1417_v16 = vadd.f32 %v1416_v46, %v1352_v11  ;;  %v1526_v46 = vadd.f32 %v3419_v35, %v1525_v26 }
 0x242   : > { %v1456_v39 = vmax.f32 %v1417_v16, 0.0 }
 0x243   : > { %v1531_v52 = vpop.f32.mrf.mxu0 }
 0x244   : > { %1613 = vmatmul.f32.gmra.mxu1 %v1456_v39 }
 0x245   : > { %v1354_v21 = vpop.f32.mrf.mxu2 }
 0x246   : > { %v1355_v25 = vadd.f32 %v1354_v21, %v1290_v19  ;;  %v1419_v20 = vpop.f32.mrf.mxu3 }
 0x248   : > { %v1420_v34 = vadd.f32 %v1419_v20, %v1355_v25 }
 0x24a   : > { %v1458_v40 = vmax.f32 %v1420_v34, 0.0  ;;  %v1532_v34 = vadd.f32 %v3419_v35, %v1531_v52 }
 0x24b   : > { %v1534_v11 = vpop.f32.mrf.mxu0 }
 0x24c   : > { %1616 = vmatmul.f32.gmra.mxu1 %v1458_v40 }
 0x24d   : > { %v1357_v22 = vpop.f32.mrf.mxu2 }
 0x24e   : > { %v1358_v14 = vadd.f32 %v1357_v22, %v1293_v0  ;;  %v1422_v3 = vpop.f32.mrf.mxu3 }
 0x250   : > { %v1423_v7 = vadd.f32 %v1422_v3, %v1358_v14  ;;  %v1535_v14 = vadd.f32 %v3419_v35, %v1534_v11 }
 0x252   : > { %v1460_v60 = vmax.f32 %v1423_v7, 0.0 }
 0x253   : > { %v1537_v19 = vpop.f32.mrf.mxu0 }
 0x254   : > { %1619 = vmatmul.f32.gmra.mxu1 %v1460_v60 }
 0x255   : > { %v1360_v12 = vpop.f32.mrf.mxu2 }
 0x256   : > { %v1361_v37 = vadd.f32 %v1360_v12, %v1296_v18  ;;  %v1425_v62 = vpop.f32.mrf.mxu3  ;;  %v1538_v12 = vadd.f32 %v3419_v35, %v1537_v19 }
 0x258   : > { %v1426_v44 = vadd.f32 %v1425_v62, %v1361_v37 }
 0x25a   : > { %v1462_v1 = vmax.f32 %v1426_v44, 0.0 }
 0x25b   : > { %v1540_v15 = vpop.f32.mrf.mxu0 }
 0x25c   : > { %1622 = vmatmul.f32.gmra.mxu1 %v1462_v1  ;;  %v1541_v44 = vadd.f32 %v3419_v35, %v1540_v15 }
 0x25d   : > { %v1363_v50 = vpop.f32.mrf.mxu2 }
 0x25e   : > { %v1364_v29 = vadd.f32 %v1363_v50, %v1299_v27  ;;  %v1428_v48 = vpop.f32.mrf.mxu3 }
 0x260   : > { %v1429_v42 = vadd.f32 %v1428_v48, %v1364_v29 }
 0x262   : > { %v1464_v30 = vmax.f32 %v1429_v42, 0.0 }
 0x263   : > { %v1543_v60 = vpop.f32.mrf.mxu0 }
 0x264   : > { %1625 = vmatmul.f32.gmra.mxu1 %v1464_v30  ;;  %v1544_v48 = vadd.f32 %v3419_v35, %v1543_v60 }
 0x265   : > { %v1366_v59 = vpop.f32.mrf.mxu2 }
 0x266   : > { %v1367_v36 = vadd.f32 %v1366_v59, %v1302_v61  ;;  %v1431_v63 = vpop.f32.mrf.mxu3 }
 0x268   : > { %v1432_v17 = vadd.f32 %v1431_v63, %v1367_v36 }
 0x26a   : > { %v1466_v33 = vmax.f32 %v1432_v17, 0.0 }
 0x26b   : > { %v1546_v9 = vpop.f32.mrf.mxu0 }
 0x26c   : > { %1628 = vmatmul.f32.gmra.mxu1 %v1466_v33  ;;  %v1547_v61 = vadd.f32 %v3419_v35, %v1546_v9 }
 0x26d   : > { %v1369_v4 = vpop.f32.mrf.mxu2 }
 0x26e   : > { %v1370_v58 = vadd.f32 %v1369_v4, %v1305_v56  ;;  %v1434_v38 = vpop.f32.mrf.mxu3 }
 0x270   : > { %v1435_v32 = vadd.f32 %v1434_v38, %v1370_v58 }
 0x272   : > { %v1468_v5 = vmax.f32 %v1435_v32, 0.0 }
 0x273   : > { %v1549_v51 = vpop.f32.mrf.mxu0 }
 0x274   : > { %1631 = vmatmul.f32.gmra.mxu1 %v1468_v5  ;;  %v1550_v33 = vadd.f32 %v3419_v35, %v1549_v51 }
 0x279   : > { %v1587_v2 = vpop.f32.mrf.mxu1 }
 0x27a   : > { %v1588_v6 = vadd.f32 %v1587_v2, %v1523_v53 }
 0x27b   : > { %v1552_v63 = vpop.f32.mrf.mxu0 }
 0x27c   : > { %v1635_v49 = vmax.f32 %v1588_v6, 0.0  ;;  %v1553_v38 = vadd.f32 %v3419_v35, %v1552_v63 }
 0x27e   : > { %v1655_v24 = vmul.f32 %v3425_v43, %v1635_v49 }
 0x280   : > { %1671 = vadd.xlane.f32.xlu0 %v1655_v24 }
 0x281   : > { %v1590_v47 = vpop.f32.mrf.mxu1 }
 0x282   : > { %v1591_v16 = vadd.f32 %v1590_v47, %v1526_v46 }
 0x283   : > { %v1555_v4 = vpop.f32.mrf.mxu0 }
 0x284   : > { %v1636_v10 = vmax.f32 %v1591_v16, 0.0  ;;  %v1556_v6 = vadd.f32 %v3419_v35, %v1555_v4 }
 0x286   : > { %v1656_v39 = vmul.f32 %v3425_v43, %v1636_v10 }
 0x288   : > { %1673 = vadd.xlane.f32.xlu0 %v1656_v39 }
 0x289   : > { %v1593_v21 = vpop.f32.mrf.mxu1 }
 0x28a   : > { %v1594_v25 = vadd.f32 %v1593_v21, %v1529_v57 }
 0x28b   : > { %v1558_v2 = vpop.f32.mrf.mxu0 }
 0x28c   : > { %v1637_v20 = vmax.f32 %v1594_v25, 0.0  ;;  %v1559_v47 = vadd.f32 %v3419_v35, %v1558_v2 }
 0x28e   : > { %v1657_v28 = vmul.f32 %v3425_v43, %v1637_v20 }
 0x290   : > { %1675 = vadd.xlane.f32.xlu1 %v1657_v28 }
 0x291   : > { %v1596_v40 = vpop.f32.mrf.mxu1 }
 0x292   : > { %v1597_v0 = vadd.f32 %v1596_v40, %v1532_v34 }
 0x293   : > { %v1561_v16 = vpop.f32.mrf.mxu0 }
 0x294   : > { %v1638_v13 = vmax.f32 %v1597_v0, 0.0  ;;  %v1562_v21 = vadd.f32 %v3419_v35, %v1561_v16 }
 0x296   : > { %v1658_v22 = vmul.f32 %v3425_v43, %v1638_v13 }
 0x298   : > { %1677 = vadd.xlane.f32.xlu1 %v1658_v22 }
 0x299   : > { %v1599_v3 = vpop.f32.mrf.mxu1 }
 0x29a   : > { %v1600_v45 = vadd.f32 %v1599_v3, %v1535_v14 }
 0x29b   : > { %v1564_v28 = vpop.f32.mrf.mxu0 }
 0x29c   : > { %v1639_v7 = vmax.f32 %v1600_v45, 0.0  ;;  %v1565_v0 = vadd.f32 %v3419_v35, %v1564_v28 }
 0x29e   : > { %v1659_v18 = vmul.f32 %v3425_v43, %v1639_v7 }
 0x2a0   : > { %1679 = vadd.xlane.f32.xlu2 %v1659_v18 }
 0x2a1   : > { %v1602_v37 = vpop.f32.mrf.mxu1 }
 0x2a2   : > { %v1603_v62 = vadd.f32 %v1602_v37, %v1538_v12 }
 0x2a3   : > { %v1567_v14 = vpop.f32.mrf.mxu0 }
 0x2a4   : > { %v1640_v23 = vmax.f32 %v1603_v62, 0.0  ;;  %v1568_v45 = vadd.f32 %v3419_v35, %v1567_v14  ;;  %v2030_v62 = vld [vmem:[#allocation2] ss:$0 sm:$0xff] }
 0x2a6   : > { %v1660_v31 = vmul.f32 %v3425_v43, %v1640_v23 }
 0x2a8   : > { %1681 = vadd.xlane.f32.xlu2 %v1660_v31 }
 0x2a9   : > { %v1605_v1 = vpop.f32.mrf.mxu1 }
 0x2aa   : > { %v1606_v27 = vadd.f32 %v1605_v1, %v1541_v44 }
 0x2ac   : > { %v1641_v50 = vmax.f32 %v1606_v27, 0.0 }
 0x2ae   : > { %v1661_v29 = vmul.f32 %v3425_v43, %v1641_v50 }
 0x2b0   : > { %1683 = vadd.xlane.f32.xlu0 %v1661_v29 }
 0x2b1   : > { %v1608_v42 = vpop.f32.mrf.mxu1 }
 0x2b2   : > { %v1609_v8 = vadd.f32 %v1608_v42, %v1544_v48 }
 0x2b4   : > { %v1642_v26 = vmax.f32 %v1609_v8, 0.0 }
 0x2b6   : > { %v1662_v30 = vmul.f32 %v3425_v43, %v1642_v26 }
 0x2b8   : > { %1685 = vadd.xlane.f32.xlu1 %v1662_v30 }
 0x2b9   : > { %v1611_v59 = vpop.f32.mrf.mxu1 }
 0x2ba   : > { %v1612_v36 = vadd.f32 %v1611_v59, %v1547_v61 }
 0x2bc   : > { %v1643_v41 = vmax.f32 %v1612_v36, 0.0 }
 0x2be   : > { %v1663_v17 = vmul.f32 %v3425_v43, %v1643_v41 }
 0x2c0   : > { %1687 = vadd.xlane.f32.xlu2 %v1663_v17 }
 0x2c1   : > { %v1614_v54 = vpop.f32.mrf.mxu1 }
 0x2c2   : > { %v1615_v55 = vadd.f32 %v1614_v54, %v1550_v33 }
 0x2c4   : > { %v1644_v56 = vmax.f32 %v1615_v55, 0.0 }
 0x2c6   : > { %v1664_v58 = vmul.f32 %v3425_v43, %v1644_v56 }
 0x2c8   : > { %1689 = vadd.xlane.f32.xlu0 %v1664_v58 }
 0x2c9   : > { %v1617_v32 = vpop.f32.mrf.mxu1 }
 0x2ca   : > { %v1618_v5 = vadd.f32 %v1617_v32, %v1553_v38 }
 0x2cc   : > { %v1645_v52 = vmax.f32 %v1618_v5, 0.0 }
 0x2ce   : > { %v1665_v53 = vmul.f32 %v3425_v43, %v1645_v52 }
 0x2d0   : > { %1691 = vadd.xlane.f32.xlu1 %v1665_v53 }
 0x2d1   : > { %v1620_v49 = vpop.f32.mrf.mxu1 }
 0x2d2   : > { %v1621_v24 = vadd.f32 %v1620_v49, %v1556_v6 }
 0x2d4   : > { %v1646_v11 = vmax.f32 %v1621_v24, 0.0 }
 0x2d6   : > { %v1666_v46 = vmul.f32 %v3425_v43, %v1646_v11 }
 0x2d8   : > { %1693 = vadd.xlane.f32.xlu2 %v1666_v46 }
 0x2d9   : > { %v1623_v10 = vpop.f32.mrf.mxu1 }
 0x2da   : > { %v1624_v39 = vadd.f32 %v1623_v10, %v1559_v47 }
 0x2dc   : > { %v1647_v57 = vmax.f32 %v1624_v39, 0.0 }
 0x2de   : > { %v1667_v19 = vmul.f32 %v3425_v43, %v1647_v57 }
 0x2e0   : > { %1695 = vadd.xlane.f32.xlu0 %v1667_v19 }
 0x2e1   : > { %v1626_v25 = vpop.f32.mrf.mxu1 }
 0x2e2   : > { %v1627_v20 = vadd.f32 %v1626_v25, %v1562_v21 }
 0x2e4   : > { %v1648_v34 = vmax.f32 %v1627_v20, 0.0 }
 0x2e6   : > { %v1668_v40 = vmul.f32 %v3425_v43, %v1648_v34 }
 0x2e8   : > { %1697 = vadd.xlane.f32.xlu1 %v1668_v40 }
 0x2e9   : > { %v1629_v15 = vpop.f32.mrf.mxu1 }
 0x2ea   : > { %v1630_v13 = vadd.f32 %v1629_v15, %v1565_v0 }
 0x2ec   : > { %v1649_v22 = vmax.f32 %v1630_v13, 0.0 }
 0x2ee   : > { %v1669_v3 = vmul.f32 %v3425_v43, %v1649_v22 }
 0x2f0   : > { %1699 = vadd.xlane.f32.xlu2 %v1669_v3 }
 0x2f1   : > { %v1632_v7 = vpop.f32.mrf.mxu1 }
 0x2f2   : > { %v1633_v60 = vadd.f32 %v1632_v7, %v1568_v45 }
 0x2f3   : > { %v1672_v37 = vpop.xlane.xlu0 %1671 }
 0x2f4   : > { %v1650_v18 = vmax.f32 %v1633_v60, 0.0  ;;  %v1707_v23 = vadd.f32 %v2030_v62, %v1672_v37 }
 0x2f6   : > { %v1670_v12 = vmul.f32 %v3425_v43, %v1650_v18  ;;  %v1723_v31 = vmax.f32 %v1707_v23, 0.0 }
 0x2f8   : > { %1701 = vadd.xlane.f32.xlu0 %v1670_v12 }
 0x2fb   : > { %v1674_v9 = vpop.xlane.xlu0 %1673 }
 0x2fc   : > { %v1708_v44 = vadd.f32 %v2030_v62, %v1674_v9 }
 0x2fe   : > { %v1724_v27 = vmax.f32 %v1708_v44, 0.0 }
 0x303   : > { %v1676_v1 = vpop.xlane.xlu1 %1675 }
 0x304   : > { %v1709_v50 = vadd.f32 %v2030_v62, %v1676_v1 }
 0x306   : > { %v1725_v29 = vmax.f32 %v1709_v50, 0.0 }
 0x30b   : > { %v1678_v35 = vpop.xlane.xlu1 %1677 }
 0x30c   : > { %v1710_v48 = vadd.f32 %v2030_v62, %v1678_v35 }
 0x30e   : > { %v1726_v42 = vmax.f32 %v1710_v48, 0.0 }
 0x313   : > { %v1680_v51 = vpop.xlane.xlu2 %1679 }
 0x314   : > { %v1711_v43 = vadd.f32 %v2030_v62, %v1680_v51 }
 0x316   : > { %v1727_v8 = vmax.f32 %v1711_v43, 0.0 }
 0x31b   : > { %v1682_v26 = vpop.xlane.xlu2 %1681 }
 0x31c   : > { %v1712_v30 = vadd.f32 %v2030_v62, %v1682_v26 }
 0x31e   : > { %v1728_v61 = vmax.f32 %v1712_v30, 0.0 }
 0x322   : > { %1739 = vxpose.xlu1.b32.start [1/16] (narrow) %v1723_v31, 8 }
 0x323   : > { %v1684_v59 = vpop.xlane.xlu0 %1683 }
 0x324   : > { %v1713_v36 = vadd.f32 %v2030_v62, %v1684_v59 }
 0x326   : > { %v1729_v63 = vmax.f32 %v1713_v36, 0.0 }
 0x32a   : > { %1740 = vxpose.xlu1.b32.cont [2/16] (narrow) %v1724_v27, 8 }
 0x32b   : > { %v1686_v41 = vpop.xlane.xlu1 %1685 }
 0x32c   : > { %v1714_v17 = vadd.f32 %v2030_v62, %v1686_v41 }
 0x32e   : > { %v1730_v33 = vmax.f32 %v1714_v17, 0.0 }
 0x332   : > { %1741 = vxpose.xlu1.b32.cont [3/16] (narrow) %v1725_v29, 8 }
 0x333   : > { %v1688_v54 = vpop.xlane.xlu2 %1687 }
 0x334   : > { %v1715_v55 = vadd.f32 %v2030_v62, %v1688_v54 }
 0x336   : > { %v1731_v56 = vmax.f32 %v1715_v55, 0.0 }
 0x33a   : > { %1742 = vxpose.xlu1.b32.cont [4/16] (narrow) %v1726_v42, 8 }
 0x33b   : > { %v1690_v4 = vpop.xlane.xlu0 %1689 }
 0x33c   : > { %v1716_v58 = vadd.f32 %v2030_v62, %v1690_v4 }
 0x33e   : > { %v1732_v38 = vmax.f32 %v1716_v58, 0.0 }
 0x342   : > { %1743 = vxpose.xlu1.b32.cont [5/16] (narrow) %v1727_v8, 8 }
 0x343   : > { %v1692_v32 = vpop.xlane.xlu1 %1691 }
 0x344   : > { %v1717_v5 = vadd.f32 %v2030_v62, %v1692_v32 }
 0x346   : > { %v1733_v52 = vmax.f32 %v1717_v5, 0.0 }
 0x34a   : > { %1744 = vxpose.xlu1.b32.cont [6/16] (narrow) %v1728_v61, 8 }
 0x34b   : > { %v1694_v53 = vpop.xlane.xlu2 %1693 }
 0x34c   : > { %v1718_v2 = vadd.f32 %v2030_v62, %v1694_v53 }
 0x34e   : > { %v1734_v6 = vmax.f32 %v1718_v2, 0.0 }
 0x352   : > { %1745 = vxpose.xlu1.b32.cont [7/16] (narrow) %v1729_v63, 8 }
 0x353   : > { %v1696_v49 = vpop.xlane.xlu0 %1695 }
 0x354   : > { %v1719_v24 = vadd.f32 %v2030_v62, %v1696_v49 }
 0x356   : > { %v1735_v11 = vmax.f32 %v1719_v24, 0.0 }
 0x35a   : > { %1746 = vxpose.xlu1.b32.cont [8/16] (narrow) %v1730_v33, 8 }
 0x35b   : > { %v1698_v46 = vpop.xlane.xlu1 %1697 }
 0x35c   : > { %v1720_v47 = vadd.f32 %v2030_v62, %v1698_v46 }
 0x35e   : > { %v1736_v16 = vmax.f32 %v1720_v47, 0.0 }
 0x362   : > { %1747 = vxpose.xlu1.b32.cont [9/16] (narrow) %v1731_v56, 8 }
 0x363   : > { %v1700_v10 = vpop.xlane.xlu2 %1699 }
 0x364   : > { %v1721_v39 = vadd.f32 %v2030_v62, %v1700_v10 }
 0x366   : > { %v1737_v57 = vmax.f32 %v1721_v39, 0.0 }
 0x36a   : > { %1748 = vxpose.xlu1.b32.cont [10/16] (narrow) %v1732_v38, 8 }
 0x36b   : > { %v1702_v19 = vpop.xlane.xlu0 %1701 }
 0x36c   : > { %v1722_v21 = vadd.f32 %v2030_v62, %v1702_v19 }
 0x36e   : > { %v1738_v25 = vmax.f32 %v1722_v21, 0.0 }
 0x372   : > { %1749 = vxpose.xlu1.b32.cont [11/16] (narrow) %v1733_v52, 8 }
 0x37a   : > { %1750 = vxpose.xlu1.b32.cont [12/16] (narrow) %v1734_v6, 8 }
 0x382   : > { %1751 = vxpose.xlu1.b32.cont [13/16] (narrow) %v1735_v11, 8 }
 0x38a   : > { %1752 = vxpose.xlu1.b32.cont [14/16] (narrow) %v1736_v16, 8 }
 0x392   : > { %1753 = vxpose.xlu1.b32.cont [15/16] (narrow) %v1737_v57, 8 }
 0x39a   : > { %1754 = vxpose.xlu1.b32.end [16/16] (narrow) %v1738_v25, 8 }
 0x3c6   : > { %v1755_v20 = vpop.trf.xlu1 }
 0x3c7   : > { %v1771_v28 = vsub.f32 0.0, %v1755_v20 }
 0x3c9   : > { %v1772_v34 = vmul.f32 1.442695, %v1771_v28 }
 0x3cb   : > { %2031 = vpow2.f32 %v1772_v34 }
 0x3d1   : > { %v2032_v40 = vpop.eup %2031 }
 0x3d2   : > { %v1774_v0 = vadd.f32 1.0, %v2032_v40 }
 0x3d4   : > { %2033 = vrcp.f32 %v1774_v0  ;;  %v1786_v14 = vand.u32 2147483648, %v1774_v0  ;;  %v1784_v45 = vand.u32 2147483647, %v1774_v0  ;;  %vm1780_vm2 = vweird.f32 %v1774_v0 }
 0x3d6   : > { %v1787_v60 = vor.u32 1.1754944e-38, %v1786_v14  ;;  %vm1785_vm4 = vcmp.eq.f32.partialorder %v1784_v45, 8.507059e+37 }
 0x3da   : > { %v2034_v15 = vpop.eup %2033 }
 0x3db   : > { %v1776_v13 = vmul.f32 %v2034_v15, %v1774_v0  ;;  %vm1781_vm1 = vweird.f32 %v2034_v15 }
 0x3dc   : > { %vm1782_vm3 = vmor %vm1780_vm2, %vm1781_vm1 }
 0x3dd   : > { %v1777_v22 = vsub.f32 1.0, %v1776_v13 }
 0x3df   : > { %v1778_v3 = vmul.f32 %v2034_v15, %v1777_v22 }
 0x3e1   : > { %v1779_v7 = vadd.f32 %v2034_v15, %v1778_v3 }
 0x3e3   : > { %v1783_v18 = vsel %vm1782_vm3, %v2034_v15, %v1779_v7 }
 0x3e4   : > { %v1788_v12 = vsel %vm1785_vm4, %v1787_v60, %v1783_v18 }
 0x3e5   : > { %1789 = vst [vmem:[%s361_s27] sm:$0x1] %v1788_v12 }
 0x3e6   : > { %2122 = shalt.err (!%p2119_p8)
}
 0x3e7   : > { %1972 = dma.vmem_to_hbm [thread:$0]  (%p2264_p5), %s1802_s28, 16, %s1804_s29, %s1791_s30  }
 0x3e8 PF: > { %p1989_p9 = scmp.ge.s32.totalorder %s2165_s14, 2  ;;  %s1815_s24 = sand.u32 1, %s2153_s11  }
 0x3e9   : > { %s1816_s22 = scalar_lea.sflag [#allocation5], %s1815_s24 }
 0x3ea   : > { %p1982_p10 = pnand %p1989_p9, %p2268_p6 }
 0x3ec   : > { %p1983_p11 = pneg %p1982_p10 }
 0x3ee   : > { %2148 = dma.done.wait (%p1983_p11), %s1816_s22, 16  }
 0x3ef   : > { %2150 = vsyncadd (%p1983_p11), %s1816_s22, 4294967280  ;;  %p23_p12 = scmp.ge.s32.totalorder %s2251_s16, 4   ;;  %s3640_s11 = smov %s2157_s12 }
 0x3f0   : > { %s3641_s12 = smov %s2161_s13  ;;  %s3642_s13 = smov %s2262_s19 }
 0x3f1   : > { %s3643_s14 = smov %s2251_s16  ;;  %25 = sbr.rel (!%p23_p12) target bundleno = 8 (0x8), region = 100 }
 0x3f6   :  { %1821 = vsyncpa [#allocation4], 1 }
 0x3f7   :  { %1823 = vsyncpa [#allocation4 + $0x1], 1 }
 0x3f8   :  { %1824 = vsyncpa [#allocation7], 1 }
 0x3f9   :  { %1825 = vsyncpa [#allocation5], 1 }
 0x3fa   :  { %1827 = vsyncpa [#allocation5 + $0x1], 1 }

</bundles_post_ra>
